<compile_context>
chip_gen: v5e
topology: v5e:2x2
jax: 0.10.0
libtpu: 0.0.40
codegen_flags: <defaults>
</compile_context>

<pallas_src>
import jax
import jax.numpy as jnp
from jax.experimental import pallas as pl
from jax.experimental.pallas import tpu as pltpu

EPS = 1e-5  # nn.BatchNorm2d default


def _round_up(x, m):
    return ((x + m - 1) // m) * m


def _vmem_spec():
    return pl.BlockSpec(memory_space=pltpu.MemorySpace.VMEM)


# ----------------------------- Pallas kernel -------------------------------

def _make_block_kernel(co, ccat, p, g, pe, shifts, inv_cnt):
    """Fused BasicBlock kernel in 'flat padded coordinates'.

    Activations are (C, PE): each image is spatially zero-padded to (H+2, Wp),
    flattened, and the flat axis carries zero guard bands (width >= Wp+1, left
    guard lane-aligned).  A 3x3 tap (dh, dw) is then a pure static lane shift
    s = (dh-1)*Wp + (dw-1).  The 9 shifted views are staged into one (9*C, P)
    VMEM operand so each conv is a single K-stacked bf16 MXU matmul; the 1x1
    shortcut rides along as extra output rows of the first matmul.  Columns
    that are padding/guard are excluded from BN statistics via `mask` and
    zeroed before they feed conv2.
    """

    def kernel(c_ref, w1_ref, w2_ref,
               g1_ref, b1_ref, g2_ref, b2_ref, gs_ref, bs_ref,
               mask_ref, o_ref, src1, h_scr, src2):
        # hoist the (1,P) -> (co,P) validity-mask broadcast (reused by 3 BNs + h1)
        mask = jnp.broadcast_to(mask_ref[...], (co, p))

        def bn(t, gamma, beta):
            # training-mode BN, two-pass (centred) masked stats, all f32
            mean = jnp.sum(t * mask, axis=1, keepdims=True) * inv_cnt
            d = t - mean
            var = jnp.sum(d * d * mask, axis=1, keepdims=True) * inv_cnt
            scale = gamma * jax.lax.rsqrt(var + EPS)          # per-channel, EUP rsqrt
            return t * scale + (beta - mean * scale)

        # ---- conv1 (+ merged 1x1 shortcut): ONE K=9*Ccat matmul ----
        for t, s in enumerate(shifts):                        # stage shifted views
            src1[t * ccat:(t + 1) * ccat, :] = c_ref[:, g + s:g + s + p]
        rs = jnp.dot(w1_ref[...], src1[...],
                     preferred_element_type=jnp.float32)      # (2*Co, P) f32

        # residual path: BN1 -> ReLU, masked to valid pixels
        h1 = jnp.maximum(bn(rs[:co], g1_ref[...], b1_ref[...]), 0.0) * mask

        # stage h1 in guard-extended flat coords; zero ONLY the guard bands
        h_scr[:, :g] = jnp.zeros((co, g), h_scr.dtype)
        h_scr[:, g + p:pe] = jnp.zeros((co, pe - g - p), h_scr.dtype)
        h_scr[:, g:g + p] = h1.astype(h_scr.dtype)

        # ---- conv2: ONE K=9*Co matmul ----
        for t, s in enumerate(shifts):
            src2[t * co:(t + 1) * co, :] = h_scr[:, g + s:g + s + p]
        r2 = jnp.dot(w2_ref[...], src2[...],
                     preferred_element_type=jnp.float32)      # (Co, P) f32

        # BN2 + shortcut-BN + residual add + final ReLU
        out = bn(r2, g2_ref[...], b2_ref[...]) + bn(rs[co:], gs_ref[...], bs_ref[...])
        o_ref[...] = jnp.maximum(out, 0.0)

    return kernel


# ------------------------------- JAX glue ----------------------------------

def up_conv_block_forward(params, x_nchw, bridge_list_nchw):
    f32, bf16 = jnp.float32, jnp.bfloat16
    n, cin, hin, win = x_nchw.shape
    co = params["up_b"].shape[0]
    h, w = 2 * hin, 2 * win

    # ---- self.up (ConvTranspose2d k=2 s=2) + concat + pad -> cat_flat (bf16) ----
    # Kept as ONE fused XLA producer of the kernel input (perf review items 4/5):
    # Cin=4 cannot fill the MXU, and a standalone pallas_call cost an extra HBM
    # round trip of up_flat.
    # TODO(synk): for production resolutions replace this glue with a Pallas 'pack'
    # kernel that writes the padded/guarded (Ccat, PE) layout directly from x and
    # the bridges (removes the remaining transpose/concat/pad HBM pass).
    up = jnp.einsum("nchw,cokl->onhkwl", x_nchw, params["up_w"])
    up = up.reshape(co, n, h, w) + params["up_b"][:, None, None, None]
    bridges = [jnp.transpose(b, (1, 0, 2, 3)) for b in bridge_list_nchw]
    cat = jnp.concatenate([up] + bridges, axis=0)              # (Ccat, N, H, W)
    ccat = cat.shape[0]

    # ---- flat padded coordinates + guard bands (all sizes computed) ----
    hp = h + 2
    wp = (w + 2) if w < 64 else _round_up(w + 2, 128)          # lane-align row stride at prod sizes
    p = n * hp * wp                                            # flat padded length
    g = _round_up(wp + 1, 128)                                 # left guard >= max tap shift, lane aligned
    g2 = (-(g + p)) % 128                                      # right guard; PE multiple of 128
    while g2 < wp + 1:
        g2 += 128
    pe = g + p + g2
    pad_r = wp - (w + 2)

    cat_flat = jnp.pad(cat, ((0, 0), (0, 0), (1, 1), (1, 1 + pad_r))).reshape(ccat, p)
    cat_flat = jnp.pad(cat_flat, ((0, 0), (g, g2))).astype(bf16)          # (Ccat, PE) bf16
    mask = jnp.pad(jnp.ones((n, h, w), f32),
                   ((0, 0), (1, 1), (1, 1 + pad_r))).reshape(1, p)        # 1 = valid pixel

    shifts = tuple((dh - 1) * wp + (dw - 1)
                   for dh in range(3) for dw in range(3))

    # ---- weight packing: K-stacked taps; shortcut row-stacked into conv1 ----
    # torch conv1 (Co, Ccat, 3, 3) -> (Co, 9*Ccat), tap-major along K (matches staging)
    w1_k = jnp.transpose(params["conv1_w"], (0, 2, 3, 1)).reshape(co, 9 * ccat)
    # 1x1 shortcut shares conv1's centre-tap operand -> extra output rows, zero elsewhere
    wsc = params["sc_w"][:, :, 0, 0]
    wsc_k = jnp.concatenate([jnp.zeros((co, 4 * ccat), f32), wsc,
                             jnp.zeros((co, 4 * ccat), f32)], axis=1)
    w_all1 = jnp.concatenate([w1_k, wsc_k], axis=0).astype(bf16)          # (2*Co, 9*Ccat)
    w2_k = jnp.transpose(params["conv2_w"], (0, 2, 3, 1)).reshape(co, 9 * co).astype(bf16)

    kernel = _make_block_kernel(co, ccat, p, g, pe, shifts, 1.0 / float(n * h * w))
    # TODO(synk): at production resolutions add an M-grid over the flat axis
    # (lane-dense 1024-4096 col tiles, two-pass cross-tile BN partials, M axis
    # "parallel" for v7x's 2nd TensorCore, vmem_limit_bytes sized under 64 MiB);
    # at these test sizes everything fits VMEM so a single un-gridded step is used.
    out_flat = pl.pallas_call(
        kernel,
        out_shape=jax.ShapeDtypeStruct((co, p), f32),
        in_specs=[_vmem_spec()] * 10,
        out_specs=_vmem_spec(),
        scratch_shapes=[pltpu.VMEM((9 * ccat, p), bf16),   # K-stacked conv1 operand
                        pltpu.VMEM((co, pe), bf16),        # h1 in guarded flat coords
                        pltpu.VMEM((9 * co, p), bf16)],    # K-stacked conv2 operand
    )(cat_flat, w_all1, w2_k,
      params["bn1_g"][:, None], params["bn1_b"][:, None],
      params["bn2_g"][:, None], params["bn2_b"][:, None],
      params["bnsc_g"][:, None], params["bnsc_b"][:, None],
      mask)

    # TODO(synk): this crop + NCHW transpose is one more HBM pass over the output;
    # a channel-major consumer (or lane-dense padded output) would skip it.
    out = out_flat.reshape(co, n, hp, wp)[:, :, 1:h + 1, 1:w + 1]
    return jnp.transpose(out, (1, 0, 2, 3))                    # back to NCHW


# ------------------------ deterministic parameter init ----------------------

def init_params(key, in_chans, bridge_chans_list, out_chans):
    ccat = out_chans + sum(bridge_chans_list)
    ks = jax.random.split(key, 5)

    def rnd(k, shape, fan_in):
        return jax.random.normal(k, shape, jnp.float32) / jnp.sqrt(float(fan_in))

    return {
        # ConvTranspose2d weight layout: (in_chans, out_chans, 2, 2)
        "up_w": rnd(ks[0], (in_chans, out_chans, 2, 2), in_chans * 4),
        "up_b": rnd(ks[1], (out_chans,), in_chans * 4),
        # Conv2d weight layout: (Cout, Cin, kH, kW)
        "conv1_w": rnd(ks[2], (out_chans, ccat, 3, 3), ccat * 9),
        "bn1_g": jnp.ones((out_chans,), jnp.float32),
        "bn1_b": jnp.zeros((out_chans,), jnp.float32),
        "conv2_w": rnd(ks[3], (out_chans, out_chans, 3, 3), out_chans * 9),
        "bn2_g": jnp.ones((out_chans,), jnp.float32),
        "bn2_b": jnp.zeros((out_chans,), jnp.float32),
        "sc_w": rnd(ks[4], (out_chans, ccat, 1, 1), ccat),
        "bnsc_g": jnp.ones((out_chans,), jnp.float32),
        "bnsc_b": jnp.zeros((out_chans,), jnp.float32),
        # TODO(synk): self.up_4 (ConvTranspose2d k=4 s=2) is unused in forward -> omitted.
    }


# --------------------------- pure-JAX reference -----------------------------

def reference_forward(params, x_nchw, bridge_list_nchw):
    n, cin, hin, win = x_nchw.shape
    co = params["up_b"].shape[0]
    up = jnp.einsum("nchw,cokl->nohkwl", x_nchw, params["up_w"])
    up = up.reshape(n, co, 2 * hin, 2 * win) + params["up_b"][None, :, None, None]
    cat = jnp.concatenate([up] + list(bridge_list_nchw), axis=1)

    def conv(x, w, pad):
        return jax.lax.conv_general_dilated(
            x, w, (1, 1), ((pad, pad), (pad, pad)),
            dimension_numbers=("NCHW", "OIHW", "NCHW"))

    def bn(x, g, b):
        mu = jnp.mean(x, axis=(0, 2, 3), keepdims=True)
        var = jnp.mean((x - mu) ** 2, axis=(0, 2, 3), keepdims=True)
        return ((x - mu) * jax.lax.rsqrt(var + EPS) * g[None, :, None, None]
                + b[None, :, None, None])

    r = jax.nn.relu(bn(conv(cat, params["conv1_w"], 1), params["bn1_g"], params["bn1_b"]))
    r = bn(conv(r, params["conv2_w"], 1), params["bn2_g"], params["bn2_b"])
    s = bn(conv(cat, params["sc_w"], 0), params["bnsc_g"], params["bnsc_b"])
    return jax.nn.relu(r + s)


# ----------------------------------- main -----------------------------------

if __name__ == "__main__":
    key = jax.random.PRNGKey(0)
    k_x, k_b1, k_b2, k_p = jax.random.split(key, 4)

    in_chans, out_chans = 4, 8
    bridge_chans_list = [4, 4]
    # x at low resolution; bridges at the upsampled resolution (UNet++ style).
    x = jax.random.normal(k_x, (2, in_chans, 8, 8), jnp.float32)
    bridges = [
        jax.random.normal(k_b1, (2, bridge_chans_list[0], 16, 16), jnp.float32),
        jax.random.normal(k_b2, (2, bridge_chans_list[1], 16, 16), jnp.float32),
    ]
    params = init_params(k_p, in_chans, bridge_chans_list, out_chans)

    fwd = jax.jit(up_conv_block_forward)
    out = jax.block_until_ready(fwd(params, x, bridges))
    ref = jax.block_until_ready(reference_forward(params, x, bridges))

    assert out.shape == (2, out_chans, 16, 16), out.shape
    assert bool(jnp.all(jnp.isfinite(out)))
    max_err = float(jnp.max(jnp.abs(out - ref)))
    # Matmul operands are bf16 (same rounding the MXU applies to f32 at default
    # precision); accumulation and BN math are f32 -> same tolerance as before.
    assert max_err < 5e-2, max_err
    print("KERNEL_OK")
</pallas_src>

<mosaic_0001>
module attributes {stable_mosaic.version = 11 : i64} {
  func.func @kernel(%arg0: memref<16x896xbf16, #tpu.memory_space<vmem>>, %arg1: memref<16x144xbf16, #tpu.memory_space<vmem>>, %arg2: memref<8x72xbf16, #tpu.memory_space<vmem>>, %arg3: memref<8x1xf32, #tpu.memory_space<vmem>>, %arg4: memref<8x1xf32, #tpu.memory_space<vmem>>, %arg5: memref<8x1xf32, #tpu.memory_space<vmem>>, %arg6: memref<8x1xf32, #tpu.memory_space<vmem>>, %arg7: memref<8x1xf32, #tpu.memory_space<vmem>>, %arg8: memref<8x1xf32, #tpu.memory_space<vmem>>, %arg9: memref<1x648xf32, #tpu.memory_space<vmem>>, %arg10: memref<8x648xf32, #tpu.memory_space<vmem>>, %arg11: memref<144x648xbf16, #tpu.memory_space<vmem>>, %arg12: memref<8x896xbf16, #tpu.memory_space<vmem>>, %arg13: memref<72x648xbf16, #tpu.memory_space<vmem>>) attributes {dimension_semantics = [], scalar_prefetch = 0 : i64, scratch_operands = 3 : i64, tpu.core_type = #tpu.core_type<tc>} {
    %c0 = arith.constant 0 : index
    %c0_0 = arith.constant 0 : index
    %0 = vector.load %arg9[%c0, %c0_0] : memref<1x648xf32, #tpu.memory_space<vmem>>, vector<1x648xf32>
    %1 = vector.shape_cast %0 : vector<1x648xf32> to vector<1x648xf32>
    %2 = vector.broadcast %1 : vector<1x648xf32> to vector<8x648xf32>
    %c0_1 = arith.constant 0 : index
    %c109 = arith.constant 109 : index
    %3 = vector.load %arg0[%c0_1, %c109] : memref<16x896xbf16, #tpu.memory_space<vmem>>, vector<16x648xbf16>
    %c0_2 = arith.constant 0 : index
    %c0_3 = arith.constant 0 : index
    %4 = vector.load %arg11[%c0_2, %c0_3] : memref<144x648xbf16, #tpu.memory_space<vmem>>, vector<16x648xbf16>
    tpu.vector_store %arg11[%c0_2, %c0_3], %3 {strides = array<i32>} : memref<144x648xbf16, #tpu.memory_space<vmem>>, vector<16x648xbf16>,
    %c0_4 = arith.constant 0 : index
    %c110 = arith.constant 110 : index
    %5 = vector.load %arg0[%c0_4, %c110] : memref<16x896xbf16, #tpu.memory_space<vmem>>, vector<16x648xbf16>
    %c16 = arith.constant 16 : index
    %c0_5 = arith.constant 0 : index
    %6 = vector.load %arg11[%c16, %c0_5] : memref<144x648xbf16, #tpu.memory_space<vmem>>, vector<16x648xbf16>
    tpu.vector_store %arg11[%c16, %c0_5], %5 {strides = array<i32>} : memref<144x648xbf16, #tpu.memory_space<vmem>>, vector<16x648xbf16>,
    %c0_6 = arith.constant 0 : index
    %c111 = arith.constant 111 : index
    %7 = vector.load %arg0[%c0_6, %c111] : memref<16x896xbf16, #tpu.memory_space<vmem>>, vector<16x648xbf16>
    %c32 = arith.constant 32 : index
    %c0_7 = arith.constant 0 : index
    %8 = vector.load %arg11[%c32, %c0_7] : memref<144x648xbf16, #tpu.memory_space<vmem>>, vector<16x648xbf16>
    tpu.vector_store %arg11[%c32, %c0_7], %7 {strides = array<i32>} : memref<144x648xbf16, #tpu.memory_space<vmem>>, vector<16x648xbf16>,
    %c0_8 = arith.constant 0 : index
    %c127 = arith.constant 127 : index
    %9 = vector.load %arg0[%c0_8, %c127] : memref<16x896xbf16, #tpu.memory_space<vmem>>, vector<16x648xbf16>
    %c48 = arith.constant 48 : index
    %c0_9 = arith.constant 0 : index
    %10 = vector.load %arg11[%c48, %c0_9] : memref<144x648xbf16, #tpu.memory_space<vmem>>, vector<16x648xbf16>
    tpu.vector_store %arg11[%c48, %c0_9], %9 {strides = array<i32>} : memref<144x648xbf16, #tpu.memory_space<vmem>>, vector<16x648xbf16>,
    %c0_10 = arith.constant 0 : index
    %c128 = arith.constant 128 : index
    %11 = vector.load %arg0[%c0_10, %c128] : memref<16x896xbf16, #tpu.memory_space<vmem>>, vector<16x648xbf16>
    %c64 = arith.constant 64 : index
    %c0_11 = arith.constant 0 : index
    %12 = vector.load %arg11[%c64, %c0_11] : memref<144x648xbf16, #tpu.memory_space<vmem>>, vector<16x648xbf16>
    tpu.vector_store %arg11[%c64, %c0_11], %11 {strides = array<i32>} : memref<144x648xbf16, #tpu.memory_space<vmem>>, vector<16x648xbf16>,
    %c0_12 = arith.constant 0 : index
    %c129 = arith.constant 129 : index
    %13 = vector.load %arg0[%c0_12, %c129] : memref<16x896xbf16, #tpu.memory_space<vmem>>, vector<16x648xbf16>
    %c80 = arith.constant 80 : index
    %c0_13 = arith.constant 0 : index
    %14 = vector.load %arg11[%c80, %c0_13] : memref<144x648xbf16, #tpu.memory_space<vmem>>, vector<16x648xbf16>
    tpu.vector_store %arg11[%c80, %c0_13], %13 {strides = array<i32>} : memref<144x648xbf16, #tpu.memory_space<vmem>>, vector<16x648xbf16>,
    %c0_14 = arith.constant 0 : index
    %c145 = arith.constant 145 : index
    %15 = vector.load %arg0[%c0_14, %c145] : memref<16x896xbf16, #tpu.memory_space<vmem>>, vector<16x648xbf16>
    %c96 = arith.constant 96 : index
    %c0_15 = arith.constant 0 : index
    %16 = vector.load %arg11[%c96, %c0_15] : memref<144x648xbf16, #tpu.memory_space<vmem>>, vector<16x648xbf16>
    tpu.vector_store %arg11[%c96, %c0_15], %15 {strides = array<i32>} : memref<144x648xbf16, #tpu.memory_space<vmem>>, vector<16x648xbf16>,
    %c0_16 = arith.constant 0 : index
    %c146 = arith.constant 146 : index
    %17 = vector.load %arg0[%c0_16, %c146] : memref<16x896xbf16, #tpu.memory_space<vmem>>, vector<16x648xbf16>
    %c112 = arith.constant 112 : index
    %c0_17 = arith.constant 0 : index
    %18 = vector.load %arg11[%c112, %c0_17] : memref<144x648xbf16, #tpu.memory_space<vmem>>, vector<16x648xbf16>
    tpu.vector_store %arg11[%c112, %c0_17], %17 {strides = array<i32>} : memref<144x648xbf16, #tpu.memory_space<vmem>>, vector<16x648xbf16>,
    %c0_18 = arith.constant 0 : index
    %c147 = arith.constant 147 : index
    %19 = vector.load %arg0[%c0_18, %c147] : memref<16x896xbf16, #tpu.memory_space<vmem>>, vector<16x648xbf16>
    %c128_19 = arith.constant 128 : index
    %c0_20 = arith.constant 0 : index
    %20 = vector.load %arg11[%c128_19, %c0_20] : memref<144x648xbf16, #tpu.memory_space<vmem>>, vector<16x648xbf16>
    tpu.vector_store %arg11[%c128_19, %c0_20], %19 {strides = array<i32>} : memref<144x648xbf16, #tpu.memory_space<vmem>>, vector<16x648xbf16>,
    %c0_21 = arith.constant 0 : index
    %c0_22 = arith.constant 0 : index
    %21 = vector.load %arg1[%c0_21, %c0_22] : memref<16x144xbf16, #tpu.memory_space<vmem>>, vector<16x144xbf16>
    %c0_23 = arith.constant 0 : index
    %c0_24 = arith.constant 0 : index
    %22 = vector.load %arg11[%c0_23, %c0_24] : memref<144x648xbf16, #tpu.memory_space<vmem>>, vector<144x648xbf16>
    %cst = arith.constant dense<0.000000e+00> : vector<16x648xf32>
    %23 = tpu.matmul %21, %22, %cst {dimension_numbers = #tpu.dot_dimension_numbers<[1], [0], [0], [1], [0, 0, 1, 1], [], []>} : vector<16x144xbf16>, vector<144x648xbf16>, vector<16x648xf32> -> vector<16x648xf32>
    %24 = vector.extract_strided_slice %23 {offsets = [0, 0], sizes = [8, 648], strides = [1, 1]} : vector<16x648xf32> to vector<8x648xf32>
    %c0_25 = arith.constant 0 : index
    %c0_26 = arith.constant 0 : index
    %25 = vector.load %arg3[%c0_25, %c0_26] : memref<8x1xf32, #tpu.memory_space<vmem>>, vector<8x1xf32>
    %c0_27 = arith.constant 0 : index
    %c0_28 = arith.constant 0 : index
    %26 = vector.load %arg4[%c0_27, %c0_28] : memref<8x1xf32, #tpu.memory_space<vmem>>, vector<8x1xf32>
    %27 = arith.mulf %24, %2 : vector<8x648xf32>
    %cst_29 = arith.constant dense<0.000000e+00> : vector<8xf32>
    %28 = vector.multi_reduction <add>, %27, %cst_29 [1] : vector<8x648xf32> to vector<8xf32>
    %29 = vector.shape_cast %28 : vector<8xf32> to vector<8x1xf32>
    %cst_30 = arith.constant 0.001953125 : f32
    %30 = vector.broadcast %cst_30 : f32 to vector<8x1xf32>
    %31 = arith.mulf %29, %30 : vector<8x1xf32>
    %32 = vector.broadcast %31 : vector<8x1xf32> to vector<8x648xf32>
    %33 = arith.subf %24, %32 : vector<8x648xf32>
    %34 = arith.mulf %33, %33 : vector<8x648xf32>
    %35 = arith.mulf %34, %2 : vector<8x648xf32>
    %cst_31 = arith.constant dense<0.000000e+00> : vector<8xf32>
    %36 = vector.multi_reduction <add>, %35, %cst_31 [1] : vector<8x648xf32> to vector<8xf32>
    %37 = vector.shape_cast %36 : vector<8xf32> to vector<8x1xf32>
    %cst_32 = arith.constant 0.001953125 : f32
    %38 = vector.broadcast %cst_32 : f32 to vector<8x1xf32>
    %39 = arith.mulf %37, %38 : vector<8x1xf32>
    %cst_33 = arith.constant 9.99999974E-6 : f32
    %40 = vector.broadcast %cst_33 : f32 to vector<8x1xf32>
    %41 = arith.addf %39, %40 : vector<8x1xf32>
    %42 = math.rsqrt %41 : vector<8x1xf32>
    %43 = arith.mulf %25, %42 : vector<8x1xf32>
    %44 = vector.broadcast %43 : vector<8x1xf32> to vector<8x648xf32>
    %45 = arith.mulf %24, %44 : vector<8x648xf32>
    %46 = arith.mulf %31, %43 : vector<8x1xf32>
    %47 = arith.subf %26, %46 : vector<8x1xf32>
    %48 = vector.broadcast %47 : vector<8x1xf32> to vector<8x648xf32>
    %49 = arith.addf %45, %48 : vector<8x648xf32>
    %cst_34 = arith.constant 0.000000e+00 : f32
    %50 = vector.broadcast %cst_34 : f32 to vector<8x648xf32>
    %51 = arith.maximumf %49, %50 : vector<8x648xf32>
    %52 = arith.mulf %51, %2 : vector<8x648xf32>
    %cst_35 = arith.constant 0.000000e+00 : bf16
    %53 = vector.broadcast %cst_35 : bf16 to vector<8x128xbf16>
    %c0_36 = arith.constant 0 : index
    %c0_37 = arith.constant 0 : index
    %54 = vector.load %arg12[%c0_36, %c0_37] : memref<8x896xbf16, #tpu.memory_space<vmem>>, vector<8x128xbf16>
    tpu.vector_store %arg12[%c0_36, %c0_37], %53 {strides = array<i32>} : memref<8x896xbf16, #tpu.memory_space<vmem>>, vector<8x128xbf16>,
    %cst_38 = arith.constant 0.000000e+00 : bf16
    %55 = vector.broadcast %cst_38 : bf16 to vector<8x120xbf16>
    %c0_39 = arith.constant 0 : index
    %c776 = arith.constant 776 : index
    %56 = vector.load %arg12[%c0_39, %c776] : memref<8x896xbf16, #tpu.memory_space<vmem>>, vector<8x120xbf16>
    tpu.vector_store %arg12[%c0_39, %c776], %55 {strides = array<i32>} : memref<8x896xbf16, #tpu.memory_space<vmem>>, vector<8x120xbf16>,
    %57 = arith.truncf %52 : vector<8x648xf32> to vector<8x648xbf16>
    %c0_40 = arith.constant 0 : index
    %c128_41 = arith.constant 128 : index
    %58 = vector.load %arg12[%c0_40, %c128_41] : memref<8x896xbf16, #tpu.memory_space<vmem>>, vector<8x648xbf16>
    tpu.vector_store %arg12[%c0_40, %c128_41], %57 {strides = array<i32>} : memref<8x896xbf16, #tpu.memory_space<vmem>>, vector<8x648xbf16>,
    %c0_42 = arith.constant 0 : index
    %c109_43 = arith.constant 109 : index
    %59 = vector.load %arg12[%c0_42, %c109_43] : memref<8x896xbf16, #tpu.memory_space<vmem>>, vector<8x648xbf16>
    %c0_44 = arith.constant 0 : index
    %c0_45 = arith.constant 0 : index
    %60 = vector.load %arg13[%c0_44, %c0_45] : memref<72x648xbf16, #tpu.memory_space<vmem>>, vector<8x648xbf16>
    tpu.vector_store %arg13[%c0_44, %c0_45], %59 {strides = array<i32>} : memref<72x648xbf16, #tpu.memory_space<vmem>>, vector<8x648xbf16>,
    %c0_46 = arith.constant 0 : index
    %c110_47 = arith.constant 110 : index
    %61 = vector.load %arg12[%c0_46, %c110_47] : memref<8x896xbf16, #tpu.memory_space<vmem>>, vector<8x648xbf16>
    %c8 = arith.constant 8 : index
    %c0_48 = arith.constant 0 : index
    %62 = vector.load %arg13[%c8, %c0_48] : memref<72x648xbf16, #tpu.memory_space<vmem>>, vector<8x648xbf16>
    tpu.vector_store %arg13[%c8, %c0_48], %61 {strides = array<i32>} : memref<72x648xbf16, #tpu.memory_space<vmem>>, vector<8x648xbf16>,
    %c0_49 = arith.constant 0 : index
    %c111_50 = arith.constant 111 : index
    %63 = vector.load %arg12[%c0_49, %c111_50] : memref<8x896xbf16, #tpu.memory_space<vmem>>, vector<8x648xbf16>
    %c16_51 = arith.constant 16 : index
    %c0_52 = arith.constant 0 : index
    %64 = vector.load %arg13[%c16_51, %c0_52] : memref<72x648xbf16, #tpu.memory_space<vmem>>, vector<8x648xbf16>
    tpu.vector_store %arg13[%c16_51, %c0_52], %63 {strides = array<i32>} : memref<72x648xbf16, #tpu.memory_space<vmem>>, vector<8x648xbf16>,
    %c0_53 = arith.constant 0 : index
    %c127_54 = arith.constant 127 : index
    %65 = vector.load %arg12[%c0_53, %c127_54] : memref<8x896xbf16, #tpu.memory_space<vmem>>, vector<8x648xbf16>
    %c24 = arith.constant 24 : index
    %c0_55 = arith.constant 0 : index
    %66 = vector.load %arg13[%c24, %c0_55] : memref<72x648xbf16, #tpu.memory_space<vmem>>, vector<8x648xbf16>
    tpu.vector_store %arg13[%c24, %c0_55], %65 {strides = array<i32>} : memref<72x648xbf16, #tpu.memory_space<vmem>>, vector<8x648xbf16>,
    %c0_56 = arith.constant 0 : index
    %c128_57 = arith.constant 128 : index
    %67 = vector.load %arg12[%c0_56, %c128_57] : memref<8x896xbf16, #tpu.memory_space<vmem>>, vector<8x648xbf16>
    %c32_58 = arith.constant 32 : index
    %c0_59 = arith.constant 0 : index
    %68 = vector.load %arg13[%c32_58, %c0_59] : memref<72x648xbf16, #tpu.memory_space<vmem>>, vector<8x648xbf16>
    tpu.vector_store %arg13[%c32_58, %c0_59], %67 {strides = array<i32>} : memref<72x648xbf16, #tpu.memory_space<vmem>>, vector<8x648xbf16>,
    %c0_60 = arith.constant 0 : index
    %c129_61 = arith.constant 129 : index
    %69 = vector.load %arg12[%c0_60, %c129_61] : memref<8x896xbf16, #tpu.memory_space<vmem>>, vector<8x648xbf16>
    %c40 = arith.constant 40 : index
    %c0_62 = arith.constant 0 : index
    %70 = vector.load %arg13[%c40, %c0_62] : memref<72x648xbf16, #tpu.memory_space<vmem>>, vector<8x648xbf16>
    tpu.vector_store %arg13[%c40, %c0_62], %69 {strides = array<i32>} : memref<72x648xbf16, #tpu.memory_space<vmem>>, vector<8x648xbf16>,
    %c0_63 = arith.constant 0 : index
    %c145_64 = arith.constant 145 : index
    %71 = vector.load %arg12[%c0_63, %c145_64] : memref<8x896xbf16, #tpu.memory_space<vmem>>, vector<8x648xbf16>
    %c48_65 = arith.constant 48 : index
    %c0_66 = arith.constant 0 : index
    %72 = vector.load %arg13[%c48_65, %c0_66] : memref<72x648xbf16, #tpu.memory_space<vmem>>, vector<8x648xbf16>
    tpu.vector_store %arg13[%c48_65, %c0_66], %71 {strides = array<i32>} : memref<72x648xbf16, #tpu.memory_space<vmem>>, vector<8x648xbf16>,
    %c0_67 = arith.constant 0 : index
    %c146_68 = arith.constant 146 : index
    %73 = vector.load %arg12[%c0_67, %c146_68] : memref<8x896xbf16, #tpu.memory_space<vmem>>, vector<8x648xbf16>
    %c56 = arith.constant 56 : index
    %c0_69 = arith.constant 0 : index
    %74 = vector.load %arg13[%c56, %c0_69] : memref<72x648xbf16, #tpu.memory_space<vmem>>, vector<8x648xbf16>
    tpu.vector_store %arg13[%c56, %c0_69], %73 {strides = array<i32>} : memref<72x648xbf16, #tpu.memory_space<vmem>>, vector<8x648xbf16>,
    %c0_70 = arith.constant 0 : index
    %c147_71 = arith.constant 147 : index
    %75 = vector.load %arg12[%c0_70, %c147_71] : memref<8x896xbf16, #tpu.memory_space<vmem>>, vector<8x648xbf16>
    %c64_72 = arith.constant 64 : index
    %c0_73 = arith.constant 0 : index
    %76 = vector.load %arg13[%c64_72, %c0_73] : memref<72x648xbf16, #tpu.memory_space<vmem>>, vector<8x648xbf16>
    tpu.vector_store %arg13[%c64_72, %c0_73], %75 {strides = array<i32>} : memref<72x648xbf16, #tpu.memory_space<vmem>>, vector<8x648xbf16>,
    %c0_74 = arith.constant 0 : index
    %c0_75 = arith.constant 0 : index
    %77 = vector.load %arg2[%c0_74, %c0_75] : memref<8x72xbf16, #tpu.memory_space<vmem>>, vector<8x72xbf16>
    %c0_76 = arith.constant 0 : index
    %c0_77 = arith.constant 0 : index
    %78 = vector.load %arg13[%c0_76, %c0_77] : memref<72x648xbf16, #tpu.memory_space<vmem>>, vector<72x648xbf16>
    %cst_78 = arith.constant dense<0.000000e+00> : vector<8x648xf32>
    %79 = tpu.matmul %77, %78, %cst_78 {dimension_numbers = #tpu.dot_dimension_numbers<[1], [0], [0], [1], [0, 0, 1, 1], [], []>} : vector<8x72xbf16>, vector<72x648xbf16>, vector<8x648xf32> -> vector<8x648xf32>
    %c0_79 = arith.constant 0 : index
    %c0_80 = arith.constant 0 : index
    %80 = vector.load %arg5[%c0_79, %c0_80] : memref<8x1xf32, #tpu.memory_space<vmem>>, vector<8x1xf32>
    %c0_81 = arith.constant 0 : index
    %c0_82 = arith.constant 0 : index
    %81 = vector.load %arg6[%c0_81, %c0_82] : memref<8x1xf32, #tpu.memory_space<vmem>>, vector<8x1xf32>
    %82 = arith.mulf %79, %2 : vector<8x648xf32>
    %cst_83 = arith.constant dense<0.000000e+00> : vector<8xf32>
    %83 = vector.multi_reduction <add>, %82, %cst_83 [1] : vector<8x648xf32> to vector<8xf32>
    %84 = vector.shape_cast %83 : vector<8xf32> to vector<8x1xf32>
    %cst_84 = arith.constant 0.001953125 : f32
    %85 = vector.broadcast %cst_84 : f32 to vector<8x1xf32>
    %86 = arith.mulf %84, %85 : vector<8x1xf32>
    %87 = vector.broadcast %86 : vector<8x1xf32> to vector<8x648xf32>
    %88 = arith.subf %79, %87 : vector<8x648xf32>
    %89 = arith.mulf %88, %88 : vector<8x648xf32>
    %90 = arith.mulf %89, %2 : vector<8x648xf32>
    %cst_85 = arith.constant dense<0.000000e+00> : vector<8xf32>
    %91 = vector.multi_reduction <add>, %90, %cst_85 [1] : vector<8x648xf32> to vector<8xf32>
    %92 = vector.shape_cast %91 : vector<8xf32> to vector<8x1xf32>
    %cst_86 = arith.constant 0.001953125 : f32
    %93 = vector.broadcast %cst_86 : f32 to vector<8x1xf32>
    %94 = arith.mulf %92, %93 : vector<8x1xf32>
    %cst_87 = arith.constant 9.99999974E-6 : f32
    %95 = vector.broadcast %cst_87 : f32 to vector<8x1xf32>
    %96 = arith.addf %94, %95 : vector<8x1xf32>
    %97 = math.rsqrt %96 : vector<8x1xf32>
    %98 = arith.mulf %80, %97 : vector<8x1xf32>
    %99 = vector.broadcast %98 : vector<8x1xf32> to vector<8x648xf32>
    %100 = arith.mulf %79, %99 : vector<8x648xf32>
    %101 = arith.mulf %86, %98 : vector<8x1xf32>
    %102 = arith.subf %81, %101 : vector<8x1xf32>
    %103 = vector.broadcast %102 : vector<8x1xf32> to vector<8x648xf32>
    %104 = arith.addf %100, %103 : vector<8x648xf32>
    %105 = vector.extract_strided_slice %23 {offsets = [8, 0], sizes = [8, 648], strides = [1, 1]} : vector<16x648xf32> to vector<8x648xf32>
    %c0_88 = arith.constant 0 : index
    %c0_89 = arith.constant 0 : index
    %106 = vector.load %arg7[%c0_88, %c0_89] : memref<8x1xf32, #tpu.memory_space<vmem>>, vector<8x1xf32>
    %c0_90 = arith.constant 0 : index
    %c0_91 = arith.constant 0 : index
    %107 = vector.load %arg8[%c0_90, %c0_91] : memref<8x1xf32, #tpu.memory_space<vmem>>, vector<8x1xf32>
    %108 = arith.mulf %105, %2 : vector<8x648xf32>
    %cst_92 = arith.constant dense<0.000000e+00> : vector<8xf32>
    %109 = vector.multi_reduction <add>, %108, %cst_92 [1] : vector<8x648xf32> to vector<8xf32>
    %110 = vector.shape_cast %109 : vector<8xf32> to vector<8x1xf32>
    %cst_93 = arith.constant 0.001953125 : f32
    %111 = vector.broadcast %cst_93 : f32 to vector<8x1xf32>
    %112 = arith.mulf %110, %111 : vector<8x1xf32>
    %113 = vector.broadcast %112 : vector<8x1xf32> to vector<8x648xf32>
    %114 = arith.subf %105, %113 : vector<8x648xf32>
    %115 = arith.mulf %114, %114 : vector<8x648xf32>
    %116 = arith.mulf %115, %2 : vector<8x648xf32>
    %cst_94 = arith.constant dense<0.000000e+00> : vector<8xf32>
    %117 = vector.multi_reduction <add>, %116, %cst_94 [1] : vector<8x648xf32> to vector<8xf32>
    %118 = vector.shape_cast %117 : vector<8xf32> to vector<8x1xf32>
    %cst_95 = arith.constant 0.001953125 : f32
    %119 = vector.broadcast %cst_95 : f32 to vector<8x1xf32>
    %120 = arith.mulf %118, %119 : vector<8x1xf32>
    %cst_96 = arith.constant 9.99999974E-6 : f32
    %121 = vector.broadcast %cst_96 : f32 to vector<8x1xf32>
    %122 = arith.addf %120, %121 : vector<8x1xf32>
    %123 = math.rsqrt %122 : vector<8x1xf32>
    %124 = arith.mulf %106, %123 : vector<8x1xf32>
    %125 = vector.broadcast %124 : vector<8x1xf32> to vector<8x648xf32>
    %126 = arith.mulf %105, %125 : vector<8x648xf32>
    %127 = arith.mulf %112, %124 : vector<8x1xf32>
    %128 = arith.subf %107, %127 : vector<8x1xf32>
    %129 = vector.broadcast %128 : vector<8x1xf32> to vector<8x648xf32>
    %130 = arith.addf %126, %129 : vector<8x648xf32>
    %131 = arith.addf %104, %130 : vector<8x648xf32>
    %cst_97 = arith.constant 0.000000e+00 : f32
    %132 = vector.broadcast %cst_97 : f32 to vector<8x648xf32>
    %133 = arith.maximumf %131, %132 : vector<8x648xf32>
    %c0_98 = arith.constant 0 : index
    %c0_99 = arith.constant 0 : index
    %134 = vector.load %arg10[%c0_98, %c0_99] : memref<8x648xf32, #tpu.memory_space<vmem>>, vector<8x648xf32>
    tpu.vector_store %arg10[%c0_98, %c0_99], %133 {strides = array<i32>} : memref<8x648xf32, #tpu.memory_space<vmem>>, vector<8x648xf32>,
    return
  }
}

</mosaic_0001>

<bundles_post_ra>
// kernel: up_conv_block_forward.1
= control target key start
LH: loop header
LB: loop body
LE: loop exit
PB: predicated region body
PF: predicated region fallthrough
CT: control target
= control target key end

     0   :  { %s2206_s19 = smov 110   ;;  %s2207_s26 = smov 111   ;;  %vm80_vm0 = vcmask 1043456   ;;  %vm101_vm1 = vcmask 64516   ;;  %vm427_vm3 = vcmask 900096   ;;  %vm374_vm4 = vcmask 908288   ;;  %s2968_s0 = inlined_call_operand.vmem [shape: bf16[16,896], index: 0, kind: input, shape index: {}]   ;;  %s2969_s1 = inlined_call_operand.vmem [shape: bf16[16,144], index: 1, kind: input, shape index: {}]   ;;  %s2970_s9 = inlined_call_operand.vmem [shape: f32[1,648], index: 9, kind: input, shape index: {}]   ;;  %s2971_s3 = inlined_call_operand.vmem [shape: f32[8,1], index: 3, kind: input, shape index: {}]   ;;  %s2972_s4 = inlined_call_operand.vmem [shape: f32[8,1], index: 4, kind: input, shape index: {}]   ;;  %s2973_s2 = inlined_call_operand.vmem [shape: bf16[8,72], index: 2, kind: input, shape index: {}]   ;;  %s2974_s7 = inlined_call_operand.vmem [shape: f32[8,1], index: 7, kind: input, shape index: {}]   ;;  %s2975_s5 = inlined_call_operand.vmem [shape: f32[8,1], index: 5, kind: input, shape index: {}]   ;;  %s2976_s6 = inlined_call_operand.vmem [shape: f32[8,1], index: 6, kind: input, shape index: {}]   ;;  %s2977_s8 = inlined_call_operand.vmem [shape: f32[8,1], index: 8, kind: input, shape index: {}]   ;;  %s2978_s10 = inlined_call_operand.vmem [shape: f32[8,648], index: 10, kind: output, shape index: {}]  }
   0x1   :  { %v400_v0 = vld [vmem:[%s2968_s0 + $0x28] sm:$0xff]  ;;  %v2276_v1 = vld [vmem:[%s2968_s0 + $0x14] sm:$0xff]  ;;  %v399_v3 = vld [vmem:[%s2968_s0 + $0x20] sm:$0xff]  ;;  %s2208_s27 = smov 127   ;;  %s2209_s28 = smov 109   ;;  %vm321_vm5 = vcmask 1039360  }
   0x2   :  { %v396_v2 = vld [vmem:[%s2968_s0 + $0x4] sm:$0xff]  ;;  %416 = vrot.lane.b32.xlu2 %v400_v0, %s2206_s19  ;;  %412 = vrot.lane.b32.xlu1 %v2276_v1, %s2206_s19  ;;  %v397_v4 = vld [vmem:[%s2968_s0 + $0xc] sm:$0xff]  ;;  %287 = vst [vmem:[#allocation2 + $0xd8] sm:$0xff] %v399_v3  ;;  %s2210_s13 = smov 1   ;;  %vm2341_vm2 = vmor %vm101_vm1, %vm80_vm0  ;;  %s2211_s23 = smov 17   ;;  %vm480_vm6 = vcmask 891904  }
   0x3   :  { %284 = vst [vmem:[#allocation2 + $0xc0] sm:$0xff] %v396_v2  ;;  %408 = vrot.lane.b32.xlu0 %v396_v2, %s2206_s19  ;;  %v2294_v5 = vld [vmem:[%s2968_s0 + $0x30] sm:$0xff]  ;;  %v214_v6 = vld [vmem:[%s2968_s0 + $0x8] sm:$0xff]  ;;  %v213_v7 = vld [vmem:[%s2968_s0] sm:$0xff]  ;;  %s2212_s24 = smov 18   ;;  %s2213_s25 = smov 19  }
   0x4   :  { %285 = vst [vmem:[#allocation2 + $0xc8] sm:$0xff] %v397_v4  ;;  %v218_v8 = vld [vmem:[%s2968_s0 + $0x24] sm:$0xff]  ;;  %v217_v9 = vld [vmem:[%s2968_s0 + $0x1c] sm:$0xff]  ;;  %v215_v10 = vld [vmem:[%s2968_s0 + $0x10] sm:$0xff]  ;;  %vm254_vm7 = vcmask 7168   ;;  %vm191_vm8 = vcmask 138240  }
   0x5   :  { %288 = vst [vmem:[#allocation2 + $0xe0] sm:$0xff] %v400_v0  ;;  %v219_v12 = vld [vmem:[%s2968_s0 + $0x2c] sm:$0xff]  ;;  %v220_v39 = vld [vmem:[%s2968_s0 + $0x34] sm:$0xf]  ;;  %v216_v43 = vld [vmem:[%s2968_s0 + $0x18] sm:$0xf] }
   0x6   :  { %286 = vst.msk [vmem:[#allocation2 + $0xd0] sm:$0xff] %vm2341_vm2, %v2276_v1  ;;  %vm837_vm9 = vcmask 130048   ;;  %vm138_vm10 = vcmask 146432   ;;  %vm82_vm11 = vcmask 154624   ;;  %vm1021_vm12 = vcmask 64512  }
   0x7   :  { %289 = vst.msk [vmem:[#allocation2 + $0xe8] sm:$0xff] %vm2341_vm2, %v2294_v5  ;;  %vm1103_vm13 = vcmask 1043520  }
   0xa   :  { %418 = vrot.lane.b32.xlu2 %v2294_v5, %s2206_s19  ;;  %414 = vrot.lane.b32.xlu1 %v399_v3, %s2206_s19 }
   0xb   :  { %410 = vrot.lane.b32.xlu0 %v397_v4, %s2206_s19 }
  0x12   :  { %359 = vrot.lane.b32.xlu2 %v2276_v1, %s2207_s26  ;;  %357 = vrot.lane.b32.xlu1 %v397_v4, %s2207_s26 }
  0x13   :  { %355 = vrot.lane.b32.xlu0 %v396_v2, %s2207_s26 }
  0x1a   :  { %365 = vrot.lane.b32.xlu2 %v2294_v5, %s2207_s26  ;;  %363 = vrot.lane.b32.xlu1 %v400_v0, %s2207_s26 }
  0x1b   :  { %361 = vrot.lane.b32.xlu0 %v399_v3, %s2207_s26 }
  0x22   :  { %306 = vrot.lane.b32.xlu2 %v2276_v1, %s2208_s27  ;;  %304 = vrot.lane.b32.xlu1 %v397_v4, %s2208_s27 }
  0x23   :  { %302 = vrot.lane.b32.xlu0 %v396_v2, %s2208_s27 }
  0x2a   :  { %312 = vrot.lane.b32.xlu2 %v2294_v5, %s2208_s27  ;;  %310 = vrot.lane.b32.xlu1 %v400_v0, %s2208_s27 }
  0x2b   :  { %308 = vrot.lane.b32.xlu0 %v399_v3, %s2208_s27 }
  0x32   :  { %467 = vrot.lane.b32.xlu2 %v399_v3, %s2209_s28  ;;  %463 = vrot.lane.b32.xlu1 %v397_v4, %s2209_s28 }
  0x33   :  { %461 = vrot.lane.b32.xlu0 %v396_v2, %s2209_s28 }
  0x3a   :  { %231 = vrot.lane.b32.xlu2 %v214_v6, %s2210_s13  ;;  %229 = vrot.lane.b32.xlu1 %v213_v7, %s2210_s13 }
  0x3b   :  { %469 = vrot.lane.b32.xlu0 %v400_v0, %s2209_s28 }
  0x42   :  { %239 = vrot.lane.b32.xlu2 %v218_v8, %s2210_s13  ;;  %237 = vrot.lane.b32.xlu1 %v217_v9, %s2210_s13 }
  0x43   :  { %233 = vrot.lane.b32.xlu0 %v215_v10, %s2210_s13 }
  0x4a   :  { %174 = vrot.lane.b32.xlu2 %v214_v6, %s2211_s23  ;;  %172 = vrot.lane.b32.xlu1 %v213_v7, %s2211_s23 }
  0x4b   :  { %241 = vrot.lane.b32.xlu0 %v219_v12, %s2210_s13 }
  0x52   :  { %180 = vrot.lane.b32.xlu2 %v218_v8, %s2211_s23  ;;  %178 = vrot.lane.b32.xlu1 %v217_v9, %s2211_s23 }
  0x53   :  { %176 = vrot.lane.b32.xlu0 %v215_v10, %s2211_s23 }
  0x5a   :  { %121 = vrot.lane.b32.xlu2 %v214_v6, %s2212_s24  ;;  %119 = vrot.lane.b32.xlu1 %v213_v7, %s2212_s24 }
  0x5b   :  { %182 = vrot.lane.b32.xlu0 %v219_v12, %s2211_s23 }
  0x5c   :  { %v417_v13 = vpop.permute.xlu2 %416 }
  0x5d   :  { %v424_v14 = vrot.slane %v417_v13, 4 }
  0x62   :  { %127 = vrot.lane.b32.xlu2 %v218_v8, %s2212_s24  ;;  %125 = vrot.lane.b32.xlu1 %v217_v9, %s2212_s24 }
  0x63   :  { %123 = vrot.lane.b32.xlu0 %v215_v10, %s2212_s24 }
  0x64   :  { %v419_v15 = vpop.permute.xlu2 %418 }
  0x65   :  { %v425_v16 = vrot.slane %v419_v15, 4 }
  0x67   :  { %v434_v17 = vsel %vm80_vm0, %v424_v14, %v425_v16  ;;  %v436_v18 = vsel %vm427_vm3, %v419_v15, %v425_v16 }
  0x68   :  { %v435_v19 = vsel %vm427_vm3, %v417_v13, %v434_v17  ;;  %448 = vst.msk [vmem:[#allocation2 + $0x178] sm:$0xff] %vm2341_vm2, %v436_v18 }
  0x69   :  { %447 = vst [vmem:[#allocation2 + $0x170] sm:$0xff] %v435_v19 }
  0x6a   :  { %64 = vrot.lane.b32.xlu2 %v214_v6, %s2213_s25  ;;  %62 = vrot.lane.b32.xlu1 %v213_v7, %s2213_s25 }
  0x6b   :  { %129 = vrot.lane.b32.xlu0 %v219_v12, %s2212_s24 }
  0x6c   :  { %v360_v20 = vpop.permute.xlu2 %359 }
  0x6d   :  { %v369_v21 = vrot.slane %v360_v20, 4 }
  0x6f   :  { %v378_v22 = vsel %vm374_vm4, %v360_v20, %v369_v21 }
  0x70   :  { %392 = vst.msk [vmem:[#allocation2 + $0x130] sm:$0xff] %vm2341_vm2, %v378_v22 }
  0x72   :  { %70 = vrot.lane.b32.xlu2 %v218_v8, %s2213_s25  ;;  %68 = vrot.lane.b32.xlu1 %v217_v9, %s2213_s25 }
  0x73   :  { %66 = vrot.lane.b32.xlu0 %v215_v10, %s2213_s25 }
  0x74   :  { %v413_v23 = vpop.permute.xlu1 %412  ;;  %v2380_v24 = vpop.permute.xlu2 %365 }
  0x75   :  { %v422_v25 = vrot.slane %v413_v23, 4  ;;  %v409_v26 = vpop.permute.xlu0 %408  ;;  %v372_v27 = vrot.slane %v2380_v24, 4 }
  0x76   :  { %v420_v35 = vrot.slane %v409_v26, 4 }
  0x77   :  { %v431_v28 = vsel %vm427_vm3, %v413_v23, %v422_v25  ;;  %v383_v29 = vsel %vm374_vm4, %v2380_v24, %v372_v27 }
  0x78   :  { %445 = vst.msk [vmem:[#allocation2 + $0x160] sm:$0xff] %vm2341_vm2, %v431_v28 }
  0x79   :  { %395 = vst.msk [vmem:[#allocation2 + $0x148] sm:$0xff] %vm2341_vm2, %v383_v29 }
  0x7a   :  { %471 = vrot.lane.b32.xlu2 %v2294_v5, %s2209_s28  ;;  %465 = vrot.lane.b32.xlu1 %v2276_v1, %s2209_s28 }
  0x7b   :  { %72 = vrot.lane.b32.xlu0 %v219_v12, %s2213_s25 }
  0x7c   :  { %v415_v30 = vpop.permute.xlu1 %414  ;;  %v307_v31 = vpop.permute.xlu2 %306 }
  0x7d   :  { %v423_v32 = vrot.slane %v415_v30, 4  ;;  %v411_v33 = vpop.permute.xlu0 %410  ;;  %v316_v34 = vrot.slane %v307_v31, 4 }
  0x7e   :  { %v421_v36 = vrot.slane %v411_v33, 4 }
  0x7f   :  { %v432_v37 = vsel %vm80_vm0, %v423_v32, %v424_v14  ;;  %v325_v38 = vsel %vm321_vm5, %v307_v31, %v316_v34 }
  0x80   :  { %v433_v40 = vsel %vm427_vm3, %v415_v30, %v432_v37  ;;  %v426_v41 = vsel %vm80_vm0, %v420_v35, %v421_v36  ;;  %v429_v42 = vsel %vm80_vm0, %v421_v36, %v422_v25  ;;  %339 = vst.msk [vmem:[#allocation2 + $0x100] sm:$0xff] %vm2341_vm2, %v325_v38  ;;  %v1882_v38 = vld [vmem:[#allocation2 + $0xc0] sm:$0xf] }
  0x81   :  { %446 = vst [vmem:[#allocation2 + $0x168] sm:$0xff] %v433_v40  ;;  %v428_v44 = vsel %vm427_vm3, %v409_v26, %v426_v41  ;;  %v430_v45 = vsel %vm427_vm3, %v411_v33, %v429_v42  ;;  %v2134_v42 = vld [vmem:[#allocation2 + $0xc4] sm:$0xf] }
  0x82   :  { %443 = vst [vmem:[#allocation2 + $0x150] sm:$0xff] %v428_v44  ;;  %243 = vrot.lane.b32.xlu1 %v220_v39, %s2210_s13  ;;  %v2137_v39 = vld [vmem:[#allocation2 + $0xd4] sm:$0xf0] }
  0x83   :  { %444 = vst [vmem:[#allocation2 + $0x158] sm:$0xff] %v430_v45  ;;  %235 = vrot.lane.b32.xlu0 %v216_v43, %s2210_s13  ;;  %v1884_v43 = vld [vmem:[#allocation2 + $0xd8] sm:$0xf0] }
  0x84   :  { %v358_v46 = vpop.permute.xlu1 %357  ;;  %v313_v47 = vpop.permute.xlu2 %312 }
  0x85   :  { %v368_v48 = vrot.slane %v358_v46, 4  ;;  %v356_v49 = vpop.permute.xlu0 %355  ;;  %v319_v50 = vrot.slane %v313_v47, 4 }
  0x86   :  { %v367_v51 = vrot.slane %v356_v49, 4 }
  0x87   :  { %v376_v52 = vsel %vm80_vm0, %v368_v48, %v369_v21  ;;  %v330_v53 = vsel %vm321_vm5, %v313_v47, %v319_v50 }
  0x88   :  { %v377_v54 = vsel %vm374_vm4, %v358_v46, %v376_v52  ;;  %v373_v55 = vsel %vm80_vm0, %v367_v51, %v368_v48  ;;  %342 = vst.msk [vmem:[#allocation2 + $0x118] sm:$0xff] %vm2341_vm2, %v330_v53  ;;  %v2155_v56 = vld [vmem:[#allocation2 + $0x164] sm:$0xf0]  ;;  %v1956_v57 = vld [vmem:[#allocation2 + $0x168] sm:$0xf0]  ;;  %v1883_v53 = vor.u32 %v2137_v39, %v1882_v38 }
  0x89   :  { %391 = vst [vmem:[#allocation2 + $0x128] sm:$0xff] %v377_v54  ;;  %v375_v58 = vsel %vm374_vm4, %v356_v49, %v373_v55  ;;  %v1954_v59 = vld [vmem:[#allocation2 + $0x150] sm:$0xf]  ;;  %v2152_v60 = vld [vmem:[#allocation2 + $0x154] sm:$0xf]  ;;  %v1887_v54 = vor.u32 %v2134_v42, %v1884_v43 }
  0x8a   :  { %390 = vst [vmem:[#allocation2 + $0x120] sm:$0xff] %v375_v58  ;;  %v1955_v61 = vor.u32 %v2155_v56, %v1954_v59  ;;  %v1959_v62 = vor.u32 %v2152_v60, %v1956_v57 }
  0x8c   :  { %841 = vmatpush.bf16.msra.mxu0 %v1955_v61  ;;  %869 = vmatpush.bf16.msra.mxu2 %v1959_v62  ;;  %v364_v63 = vpop.permute.xlu1 %363  ;;  %v2419_v0 = vpop.permute.xlu2 %467 }
  0x8d   :  { %v371_v1 = vrot.slane %v364_v63, 4  ;;  %v362_v2 = vpop.permute.xlu0 %361  ;;  %v476_v57 = vrot.slane %v2419_v0, 4 }
  0x8e   :  { %v370_v3 = vrot.slane %v362_v2, 4 }
  0x8f   :  { %v381_v4 = vsel %vm80_vm0, %v371_v1, %v372_v27 }
  0x90   :  { %v382_v5 = vsel %vm374_vm4, %v364_v63, %v381_v4  ;;  %v379_v6 = vsel %vm80_vm0, %v370_v3, %v371_v1 }
  0x91   :  { %394 = vst [vmem:[#allocation2 + $0x140] sm:$0xff] %v382_v5  ;;  %v380_v7 = vsel %vm374_vm4, %v362_v2, %v379_v6  ;;  %v1930_v17 = vld [vmem:[#allocation2 + $0x120] sm:$0xf]  ;;  %v2146_v18 = vld [vmem:[#allocation2 + $0x124] sm:$0xf] }
  0x92   :  { %393 = vst [vmem:[#allocation2 + $0x138] sm:$0xff] %v380_v7 }
  0x94   :  { %v305_v8 = vpop.permute.xlu1 %304  ;;  %v2425_v9 = vpop.permute.xlu2 %231 }
  0x95   :  { %v315_v10 = vrot.slane %v305_v8, 4  ;;  %v303_v12 = vpop.permute.xlu0 %302 }
  0x96   :  { %v314_v13 = vrot.slane %v303_v12, 4 }
  0x97   :  { %v323_v14 = vsel %vm80_vm0, %v315_v10, %v316_v34 }
  0x98   :  { %v324_v15 = vsel %vm321_vm5, %v305_v8, %v323_v14  ;;  %v320_v16 = vsel %vm80_vm0, %v314_v13, %v315_v10 }
  0x99   :  { %338 = vst [vmem:[#allocation2 + $0xf8] sm:$0xff] %v324_v15  ;;  %v322_v19 = vsel %vm321_vm5, %v303_v12, %v320_v16  ;;  %v2149_v20 = vld [vmem:[#allocation2 + $0x134] sm:$0xf0]  ;;  %v1932_v21 = vld [vmem:[#allocation2 + $0x138] sm:$0xf0] }
  0x9a   :  { %337 = vst [vmem:[#allocation2 + $0xf0] sm:$0xff] %v322_v19  ;;  %v1931_v22 = vor.u32 %v2149_v20, %v1930_v17  ;;  %v1935_v23 = vor.u32 %v2146_v18, %v1932_v21  ;;  %v1962_v12 = vld [vmem:[#allocation2 + $0x158] sm:$0xf]  ;;  %v2156_v18 = vld [vmem:[#allocation2 + $0x16c] sm:$0xf0] }
  0x9b   :  { %v1963_v20 = vor.u32 %v2156_v18, %v1962_v12 }
  0x9c   :  { %842 = vmatpush.bf16.msra.mxu0 %v1931_v22  ;;  %870 = vmatpush.bf16.msra.mxu2 %v1935_v23  ;;  %v311_v24 = vpop.permute.xlu1 %310  ;;  %v2431_v25 = vpop.permute.xlu2 %239  ;;  %v2150_v23 = vld [vmem:[#allocation2 + $0x13c] sm:$0xf0] }
  0x9d   :  { %v318_v26 = vrot.slane %v311_v24, 4  ;;  %v309_v27 = vpop.permute.xlu0 %308  ;;  %v250_v63 = vrot.slane %v2431_v25, 4 }
  0x9e   :  { %v317_v28 = vrot.slane %v309_v27, 4 }
  0x9f   :  { %v328_v29 = vsel %vm80_vm0, %v318_v26, %v319_v50  ;;  %v246_v50 = vrot.slane %v2425_v9, 4 }
  0xa0   :  { %v329_v30 = vsel %vm321_vm5, %v311_v24, %v328_v29  ;;  %v326_v31 = vsel %vm80_vm0, %v317_v28, %v318_v26  ;;  %v1914_v43 = vld [vmem:[#allocation2 + $0xf8] sm:$0xf] }
  0xa1   :  { %341 = vst [vmem:[#allocation2 + $0x110] sm:$0xff] %v329_v30  ;;  %v327_v32 = vsel %vm321_vm5, %v309_v27, %v326_v31  ;;  %v1906_v41 = vld [vmem:[#allocation2 + $0xf0] sm:$0xf]  ;;  %v2140_v46 = vld [vmem:[#allocation2 + $0xf4] sm:$0xf] }
  0xa2   :  { %340 = vst [vmem:[#allocation2 + $0x108] sm:$0xff] %v327_v32  ;;  %v1938_v27 = vld [vmem:[#allocation2 + $0x128] sm:$0xf] }
  0xa3   :  { %v1939_v29 = vor.u32 %v2150_v23, %v1938_v27 }
  0xa4   :  { %v2437_v33 = vpop.permute.xlu1 %463  ;;  %v2439_v34 = vpop.permute.xlu2 %174 }
  0xa5   :  { %v474_v35 = vrot.slane %v2437_v33, 4  ;;  %v462_v36 = vpop.permute.xlu0 %461  ;;  %v185_v19 = vrot.slane %v2439_v34, 4 }
  0xa6   :  { %v473_v37 = vrot.slane %v462_v36, 4 }
  0xa8   :  { %v479_v40 = vsel %vm80_vm0, %v473_v37, %v474_v35  ;;  %v2144_v31 = vld [vmem:[#allocation2 + $0x10c] sm:$0xf0] }
  0xa9   :  { %v481_v44 = vsel %vm480_vm6, %v462_v36, %v479_v40  ;;  %v2143_v45 = vld [vmem:[#allocation2 + $0x104] sm:$0xf0]  ;;  %v1908_v47 = vld [vmem:[#allocation2 + $0x108] sm:$0xf0] }
  0xaa   :  { %496 = vst [vmem:[#allocation2 + $0x180] sm:$0xff] %v481_v44  ;;  %v1907_v48 = vor.u32 %v2143_v45, %v1906_v41  ;;  %v1911_v49 = vor.u32 %v2140_v46, %v1908_v47  ;;  %v1890_v44 = vld [vmem:[#allocation2 + $0xc8] sm:$0xf]  ;;  %v2138_v45 = vld [vmem:[#allocation2 + $0xdc] sm:$0xf0]  ;;  %v1915_v47 = vor.u32 %v2144_v31, %v1914_v43 }
  0xac   :  { %843 = vmatpush.bf16.msra.mxu0 %v1907_v48  ;;  %871 = vmatpush.bf16.msra.mxu2 %v1911_v49  ;;  %v230_v51 = vpop.permute.xlu1 %229  ;;  %v2447_v52 = vpop.permute.xlu2 %180 }
  0xad   :  { %v2449_v55 = vpop.permute.xlu0 %469  ;;  %v245_v56 = vrot.slane %v230_v51, 4  ;;  %v188_v46 = vrot.slane %v2447_v52, 4 }
  0xae   :  { %v477_v58 = vrot.slane %v2449_v55, 4 }
  0xaf   :  { %v253_v59 = vsel %vm80_vm0, %v245_v56, %v246_v50 }
  0xb0   :  { %v485_v60 = vsel %vm80_vm0, %v476_v57, %v477_v58  ;;  %v255_v61 = vsel %vm254_vm7, %v230_v51, %v253_v59  ;;  %844 = vmatpush.bf16.msra.mxu0 %v1883_v53  ;;  %872 = vmatpush.bf16.msra.mxu2 %v1887_v54 }
  0xb1   :  { %v486_v62 = vsel %vm480_vm6, %v2419_v0, %v485_v60  ;;  %272 = vst [vmem:[#allocation2 + $0x90] sm:$0xff] %v255_v61  ;;  %v1978_v8 = vld [vmem:[#allocation2 + $0x180] sm:$0xf]  ;;  %v2158_v10 = vld [vmem:[#allocation2 + $0x184] sm:$0xf] }
  0xb2   :  { %499 = vst [vmem:[#allocation2 + $0x198] sm:$0xff] %v486_v62 }
  0xb4   :  { %v238_v1 = vpop.permute.xlu1 %237  ;;  %v2461_v2 = vpop.permute.xlu2 %121 }
  0xb5   :  { %v2463_v3 = vpop.permute.xlu0 %233  ;;  %v249_v4 = vrot.slane %v238_v1, 4 }
  0xb6   :  { %v247_v5 = vrot.slane %v2463_v3, 4 }
  0xb7   :  { %v260_v6 = vsel %vm80_vm0, %v249_v4, %v250_v63 }
  0xb8   :  { %v256_v7 = vsel %vm80_vm0, %v246_v50, %v247_v5  ;;  %v261_v0 = vsel %vm254_vm7, %v238_v1, %v260_v6  ;;  %v1858_v30 = vld [vmem:[#allocation2 + $0x90] sm:$0xf]  ;;  %v2128_v38 = vld [vmem:[#allocation2 + $0x94] sm:$0xf]  ;;  %v132_v1 = vrot.slane %v2461_v2, 4 }
  0xb9   :  { %v257_v13 = vsel %vm254_vm7, %v2425_v9, %v256_v7  ;;  %275 = vst [vmem:[#allocation2 + $0xa8] sm:$0xff] %v261_v0  ;;  %v2161_v14 = vld [vmem:[#allocation2 + $0x194] sm:$0xf0]  ;;  %v1980_v15 = vld [vmem:[#allocation2 + $0x198] sm:$0xf0] }
  0xba   :  { %273 = vst [vmem:[#allocation2 + $0x98] sm:$0xff] %v257_v13  ;;  %v1979_v16 = vor.u32 %v2161_v14, %v1978_v8  ;;  %v1983_v17 = vor.u32 %v2158_v10, %v1980_v15  ;;  %v2108_v7 = vld [vmem:[%s2969_s1 + $0x4] sm:$0xf] }
  0xbc   :  { %862 = vmatpush.bf16.msra.mxu1 %v1979_v16  ;;  %890 = vmatpush.bf16.msra.mxu3 %v1983_v17  ;;  %v173_v21 = vpop.permute.xlu1 %172  ;;  %v2474_v22 = vpop.permute.xlu2 %127 }
  0xbd   :  { %v2476_v24 = vpop.permute.xlu0 %241  ;;  %v184_v9 = vrot.slane %v173_v21, 4  ;;  %v135_v23 = vrot.slane %v2474_v22, 4 }
  0xbe   :  { %v251_v26 = vrot.slane %v2476_v24, 4 }
  0xbf   :  { %v190_v28 = vsel %vm80_vm0, %v184_v9, %v185_v19 }
  0xc0   :  { %897 = vmatpush.bf16.msrb.mxu1 %v1963_v20  ;;  %v262_v32 = vsel %vm80_vm0, %v250_v63, %v251_v26  ;;  %v192_v36 = vsel %vm191_vm8, %v173_v21, %v190_v28  ;;  %v2131_v37 = vld [vmem:[#allocation2 + $0xa4] sm:$0xf0]  ;;  %v1860_v39 = vld [vmem:[#allocation2 + $0xa8] sm:$0xf0] }
  0xc1   :  { %v263_v40 = vsel %vm254_vm7, %v2431_v25, %v262_v32  ;;  %207 = vst [vmem:[#allocation2 + $0x60] sm:$0xff] %v192_v36  ;;  %v1859_v41 = vor.u32 %v2131_v37, %v1858_v30  ;;  %v1863_v42 = vor.u32 %v2128_v38, %v1860_v39  ;;  %v1891_v25 = vor.u32 %v2138_v45, %v1890_v44  ;;  %v1866_v61 = vld [vmem:[#allocation2 + $0x98] sm:$0xf] }
  0xc2   :  { %276 = vst [vmem:[#allocation2 + $0xb0] sm:$0xff] %v263_v40 }
  0xc3   :  { %845 = vmatpush.bf16.msra.mxu0 %v1859_v41  ;;  %873 = vmatpush.bf16.msra.mxu2 %v1863_v42 }
  0xc4   :  { %898 = vmatpush.bf16.msrb.mxu1 %v1939_v29  ;;  %v179_v48 = vpop.permute.xlu1 %178  ;;  %v2487_v49 = vpop.permute.xlu2 %64 }
  0xc5   :  { %v177_v50 = vpop.permute.xlu0 %176  ;;  %v187_v51 = vrot.slane %v179_v48, 4 }
  0xc6   :  { %v186_v53 = vrot.slane %v177_v50, 4 }
  0xc7   :  { %v196_v54 = vsel %vm80_vm0, %v187_v51, %v188_v46 }
  0xc8   :  { %899 = vmatpush.bf16.msrb.mxu1 %v1915_v47  ;;  %v193_v56 = vsel %vm80_vm0, %v185_v19, %v186_v53  ;;  %v195_v57 = vsel %vm191_vm8, %v177_v50, %v186_v53  ;;  %v197_v59 = vsel %vm191_vm8, %v179_v48, %v196_v54  ;;  %v1834_v18 = vld [vmem:[#allocation2 + $0x60] sm:$0xf]  ;;  %v2122_v19 = vld [vmem:[#allocation2 + $0x64] sm:$0xf] }
  0xc9   :  { %v194_v60 = vsel %vm191_vm8, %v2439_v34, %v193_v56  ;;  %209 = vst.msk [vmem:[#allocation2 + $0x70] sm:$0xff] %vm2341_vm2, %v195_v57  ;;  %v2132_v62 = vld [vmem:[#allocation2 + $0xac] sm:$0xf0]  ;;  %v1780_v34 = vld [vmem:[%s2969_s1 + $0x8] sm:$0xf0] }
  0xca   :  { %208 = vst [vmem:[#allocation2 + $0x68] sm:$0xff] %v194_v60  ;;  %v1867_v63 = vor.u32 %v2132_v62, %v1866_v61  ;;  %v2506_v10 = vor.u32 %v2108_v7, %v1780_v34 }
  0xcb   :  { %210 = vst [vmem:[#allocation2 + $0x78] sm:$0xff] %v197_v59 }
  0xcc   :  { %900 = vmatpush.bf16.msrb.mxu1 %v1891_v25  ;;  %v120_v4 = vpop.permute.xlu1 %119  ;;  %v2498_v6 = vpop.permute.xlu2 %70  ;;  %2001 = vmatmul.msk.bf16.vlgmr.msra.gmra.mxu3 %vm837_vm9, %v2506_v10 }
  0xcd   :  { %v183_v0 = vpop.permute.xlu0 %182  ;;  %v131_v8 = vrot.slane %v120_v4, 4  ;;  %2000 = vmatmul.msk.bf16.vlgmr.msra.gmra.mxu1 %vm837_vm9, %v2506_v10  ;;  %v78_v61 = vrot.slane %v2498_v6, 4 }
  0xce   :  { %v189_v12 = vrot.slane %v183_v0, 4 }
  0xcf   :  { %v137_v13 = vsel %vm80_vm0, %v131_v8, %v132_v1 }
  0xd0   :  { %901 = vmatpush.bf16.msrb.mxu1 %v1867_v63  ;;  %v198_v14 = vsel %vm80_vm0, %v188_v46, %v189_v12  ;;  %v200_v15 = vsel %vm191_vm8, %v183_v0, %v189_v12  ;;  %v139_v16 = vsel %vm138_vm10, %v120_v4, %v137_v13  ;;  %v75_v46 = vrot.slane %v2487_v49, 4 }
  0xd1   :  { %v199_v17 = vsel %vm191_vm8, %v2447_v52, %v198_v14  ;;  %212 = vst.msk [vmem:[#allocation2 + $0x88] sm:$0xff] %vm2341_vm2, %v200_v15  ;;  %v1842_v43 = vld [vmem:[#allocation2 + $0x68] sm:$0xf] }
  0xd2   :  { %211 = vst [vmem:[#allocation2 + $0x80] sm:$0xff] %v199_v17  ;;  %v2125_v20 = vld [vmem:[#allocation2 + $0x74] sm:$0xf0]  ;;  %v1836_v21 = vld [vmem:[#allocation2 + $0x78] sm:$0xf0] }
  0xd3   :  { %154 = vst [vmem:[#allocation2 + $0x30] sm:$0xff] %v139_v16  ;;  %v1835_v9 = vor.u32 %v2125_v20, %v1834_v18  ;;  %v1839_v27 = vor.u32 %v2122_v19, %v1836_v21 }
  0xd4   :  { %v126_v28 = vpop.permute.xlu1 %125  ;;  %v472_v29 = vpop.permute.xlu2 %471 }
  0xd5   :  { %846 = vmatpush.bf16.msra.mxu0 %v1835_v9  ;;  %874 = vmatpush.bf16.msra.mxu2 %v1839_v27  ;;  %v124_v30 = vpop.permute.xlu0 %123  ;;  %v134_v31 = vrot.slane %v126_v28, 4  ;;  %v478_v52 = vrot.slane %v472_v29, 4  ;;  %v2157_v9 = vld [vmem:[#allocation2 + $0x174] sm:$0xf0] }
  0xd6   :  { %v133_v32 = vrot.slane %v124_v30, 4 }
  0xd7   :  { %v143_v36 = vsel %vm80_vm0, %v134_v31, %v135_v23  ;;  %v487_v37 = vsel %vm80_vm0, %v477_v58, %v478_v52  ;;  %v489_v38 = vsel %vm480_vm6, %v472_v29, %v478_v52 }
  0xd8   :  { %v140_v39 = vsel %vm80_vm0, %v132_v1, %v133_v32  ;;  %v142_v40 = vsel %vm138_vm10, %v124_v30, %v133_v32  ;;  %v144_v41 = vsel %vm138_vm10, %v126_v28, %v143_v36  ;;  %501 = vst.msk [vmem:[#allocation2 + $0x1a8] sm:$0xff] %vm2341_vm2, %v489_v38  ;;  %v488_v58 = vsel %vm480_vm6, %v2449_v55, %v487_v37  ;;  %v1778_v30 = vld [vmem:[%s2969_s1] sm:$0xf] }
  0xd9   :  { %v141_v42 = vsel %vm138_vm10, %v2461_v2, %v140_v39  ;;  %156 = vst.msk [vmem:[#allocation2 + $0x40] sm:$0xff] %vm2341_vm2, %v142_v40  ;;  %v2126_v44 = vld [vmem:[#allocation2 + $0x7c] sm:$0xf0] }
  0xda   :  { %155 = vst [vmem:[#allocation2 + $0x38] sm:$0xff] %v141_v42  ;;  %v1843_v45 = vor.u32 %v2126_v44, %v1842_v43  ;;  %v1810_v56 = vld [vmem:[#allocation2 + $0x30] sm:$0xf]  ;;  %v2116_v57 = vld [vmem:[#allocation2 + $0x34] sm:$0xf] }
  0xdb   :  { %157 = vst [vmem:[#allocation2 + $0x48] sm:$0xff] %v144_v41  ;;  %v2151_v43 = vld [vmem:[#allocation2 + $0x144] sm:$0xf0] }
  0xdc   :  { %500 = vst [vmem:[#allocation2 + $0x1a0] sm:$0xff] %v488_v58  ;;  %902 = vmatpush.bf16.msrb.mxu1 %v1843_v45  ;;  %v63_v47 = vpop.permute.xlu1 %62 }
  0xdd   :  { %v130_v48 = vpop.permute.xlu0 %129  ;;  %v74_v50 = vrot.slane %v63_v47, 4 }
  0xde   :  { %v136_v2 = vrot.slane %v130_v48, 4 }
  0xdf   :  { %v81_v51 = vsel %vm80_vm0, %v74_v50, %v75_v46 }
  0xe0   :  { %v145_v25 = vsel %vm80_vm0, %v135_v23, %v136_v2  ;;  %v147_v55 = vsel %vm138_vm10, %v130_v48, %v136_v2  ;;  %v83_v53 = vsel %vm82_vm11, %v63_v47, %v81_v51  ;;  %v1922_v47 = vld [vmem:[#allocation2 + $0x100] sm:$0xf]  ;;  %v2145_v48 = vld [vmem:[#allocation2 + $0x114] sm:$0xf0] }
  0xe1   :  { %v146_v54 = vsel %vm138_vm10, %v2474_v22, %v145_v25  ;;  %159 = vst.msk [vmem:[#allocation2 + $0x58] sm:$0xff] %vm2341_vm2, %v147_v55  ;;  %v1818_v14 = vld [vmem:[#allocation2 + $0x38] sm:$0xf] }
  0xe2   :  { %158 = vst [vmem:[#allocation2 + $0x50] sm:$0xff] %v146_v54  ;;  %v2119_v59 = vld [vmem:[#allocation2 + $0x44] sm:$0xf0]  ;;  %v1812_v60 = vld [vmem:[#allocation2 + $0x48] sm:$0xf0] }
  0xe3   :  { %98 = vst [vmem:[#allocation2] sm:$0xff] %v83_v53  ;;  %v1811_v62 = vor.u32 %v2119_v59, %v1810_v56  ;;  %v1815_v63 = vor.u32 %v2116_v57, %v1812_v60  ;;  %v2162_v55 = vld [vmem:[#allocation2 + $0x19c] sm:$0xf0]  ;;  %v1988_v53 = vld [vmem:[#allocation2 + $0x1a0] sm:$0xf0] }
  0xe4   :  { %v69_v1 = vpop.permute.xlu1 %68  ;;  %v2154_v54 = vld [vmem:[#allocation2 + $0x164] sm:$0xf] }
  0xe5   :  { %847 = vmatpush.bf16.msra.mxu0 %v1811_v62  ;;  %875 = vmatpush.bf16.msra.mxu2 %v1815_v63  ;;  %v67_v4 = vpop.permute.xlu0 %66  ;;  %v77_v7 = vrot.slane %v69_v1, 4  ;;  %v1964_v63 = vld [vmem:[#allocation2 + $0x170] sm:$0xf0] }
  0xe6   :  { %v76_v34 = vrot.slane %v67_v4, 4 }
  0xe7   :  { %v87_v22 = vsel %vm80_vm0, %v77_v7, %v78_v61 }
  0xe8   :  { %v84_v0 = vsel %vm80_vm0, %v75_v46, %v76_v34  ;;  %v86_v8 = vsel %vm82_vm11, %v67_v4, %v76_v34  ;;  %v88_v12 = vsel %vm82_vm11, %v69_v1, %v87_v22  ;;  %v2153_v46 = vld [vmem:[#allocation2 + $0x15c] sm:$0xf]  ;;  %v1898_v1 = vld [vmem:[#allocation2 + $0xd0] sm:$0xf]  ;;  %v2139_v4 = vld [vmem:[#allocation2 + $0xe4] sm:$0xf0] }
  0xe9   :  { %v85_v13 = vsel %vm82_vm11, %v2487_v49, %v84_v0  ;;  %103 = vst.msk [vmem:[#allocation2 + $0x10] sm:$0xff] %vm2341_vm2, %v86_v8  ;;  %v2120_v15 = vld [vmem:[#allocation2 + $0x4c] sm:$0xf0]  ;;  %v1970_v49 = vld [vmem:[#allocation2 + $0x160] sm:$0xf]  ;;  %v1967_v7 = vor.u32 %v2153_v46, %v1964_v63 }
  0xea   :  { %99 = vst [vmem:[#allocation2 + $0x8] sm:$0xff] %v85_v13  ;;  %v1819_v16 = vor.u32 %v2120_v15, %v1818_v14  ;;  %v1786_v52 = vld [vmem:[#allocation2] sm:$0xf]  ;;  %v2110_v32 = vld [vmem:[#allocation2 + $0x4] sm:$0xf]  ;;  %v1971_v39 = vor.u32 %v2157_v9, %v1970_v49  ;;  %v1899_v14 = vor.u32 %v2139_v4, %v1898_v1 }
  0xeb   :  { %104 = vst [vmem:[#allocation2 + $0x18] sm:$0xff] %v88_v12  ;;  %v2163_v34 = vld [vmem:[#allocation2 + $0x1a4] sm:$0xf0]  ;;  %v1940_v12 = vld [vmem:[#allocation2 + $0x140] sm:$0xf0] }
  0xec   :  { %903 = vmatpush.bf16.msrb.mxu1 %v1819_v16  ;;  %v466_v17 = vpop.permute.xlu1 %465  ;;  %v1996_v13 = vld [vmem:[#allocation2 + $0x1a8] sm:$0xf0]  ;;  %v2148_v15 = vld [vmem:[#allocation2 + $0x134] sm:$0xf] }
  0xed   :  { %v73_v18 = vpop.permute.xlu0 %72  ;;  %v475_v19 = vrot.slane %v466_v17, 4  ;;  %v1948_v16 = vld [vmem:[#allocation2 + $0x148] sm:$0xf0] }
  0xee   :  { %v79_v20 = vrot.slane %v73_v18, 4 }
  0xef   :  { %v482_v21 = vsel %vm80_vm0, %v474_v35, %v475_v19  ;;  %v484_v23 = vsel %vm480_vm6, %v466_v17, %v475_v19  ;;  %v2109_v35 = vld [vmem:[%s2969_s1 + $0x4] sm:$0xf0] }
  0xf0   :  { %v89_v27 = vsel %vm80_vm0, %v78_v61, %v79_v20  ;;  %v91_v28 = vsel %vm82_vm11, %v73_v18, %v79_v20  ;;  %v483_v29 = vsel %vm480_vm6, %v2437_v33, %v482_v21  ;;  %498 = vst.msk [vmem:[#allocation2 + $0x190] sm:$0xff] %vm2341_vm2, %v484_v23  ;;  %v2575_v41 = vor.u32 %v2109_v35, %v1778_v30  ;;  %v2147_v18 = vld [vmem:[#allocation2 + $0x12c] sm:$0xf]  ;;  %v1916_v23 = vld [vmem:[#allocation2 + $0x110] sm:$0xf0] }
  0xf1   :  { %v90_v31 = vsel %vm82_vm11, %v2498_v6, %v89_v27  ;;  %106 = vst.msk [vmem:[#allocation2 + $0x28] sm:$0xff] %vm2341_vm2, %v91_v28  ;;  %v1946_v6 = vld [vmem:[#allocation2 + $0x130] sm:$0xf]  ;;  %v1794_v25 = vld [vmem:[#allocation2 + $0x8] sm:$0xf]  ;;  %v1943_v19 = vor.u32 %v2147_v18, %v1940_v12  ;;  %v1951_v21 = vor.u32 %v2148_v15, %v1948_v16 }
  0xf2   :  { %105 = vst [vmem:[#allocation2 + $0x20] sm:$0xff] %v90_v31  ;;  %v2113_v33 = vld [vmem:[#allocation2 + $0x14] sm:$0xf0]  ;;  %v1788_v36 = vld [vmem:[#allocation2 + $0x18] sm:$0xf0]  ;;  %v1947_v51 = vor.u32 %v2151_v43, %v1946_v6 }
  0xf3   :  { %497 = vst [vmem:[#allocation2 + $0x188] sm:$0xff] %v483_v29  ;;  %v1787_v37 = vor.u32 %v2113_v33, %v1786_v52  ;;  %v1791_v38 = vor.u32 %v2110_v32, %v1788_v36  ;;  %v2142_v27 = vld [vmem:[#allocation2 + $0x104] sm:$0xf]  ;;  %v1924_v28 = vld [vmem:[#allocation2 + $0x118] sm:$0xf0] }
  0xf4   :  { %v244_v40 = vpop.permute.xlu1 %243  ;;  %v2141_v29 = vld [vmem:[#allocation2 + $0xfc] sm:$0xf]  ;;  %v2135_v30 = vld [vmem:[#allocation2 + $0xcc] sm:$0xf]  ;;  %v1892_v35 = vld [vmem:[#allocation2 + $0xe0] sm:$0xf0]  ;;  %v1927_v33 = vor.u32 %v2142_v27, %v1924_v28 }
  0xf5   :  { %848 = vmatpush.bf16.msra.mxu0 %v1787_v37  ;;  %876 = vmatpush.bf16.msra.mxu2 %v1791_v38  ;;  %v236_v42 = vpop.permute.xlu0 %235  ;;  %v252_v58 = vrot.slane %v244_v40, 4  ;;  %v1919_v31 = vor.u32 %v2141_v29, %v1916_v23  ;;  %v2136_v52 = vld [vmem:[#allocation2 + $0xd4] sm:$0xf]  ;;  %v1900_v32 = vld [vmem:[#allocation2 + $0xe8] sm:$0xf0]  ;;  %v1895_v37 = vor.u32 %v2135_v30, %v1892_v35 }
  0xf6   :  { %v248_v44 = vrot.slane %v236_v42, 4  ;;  %v2127_v36 = vld [vmem:[#allocation2 + $0x84] sm:$0xf0]  ;;  %v1850_v38 = vld [vmem:[#allocation2 + $0x70] sm:$0xf] }
  0xf7   :  { %v264_v45 = vsel %vm80_vm0, %v251_v26, %v252_v58  ;;  %v1972_v26 = vld [vmem:[#allocation2 + $0x178] sm:$0xf0]  ;;  %v1994_v57 = vld [vmem:[#allocation2 + $0x190] sm:$0xf]  ;;  %v2160_v22 = vld [vmem:[#allocation2 + $0x194] sm:$0xf]  ;;  %v1851_v40 = vor.u32 %v2127_v36, %v1850_v38 }
  0xf8   :  { %v258_v50 = vsel %vm80_vm0, %v247_v5, %v248_v44  ;;  %v265_v2 = vsel %vm254_vm7, %v2476_v24, %v264_v45  ;;  %849 = vmatmul.bf16.vlgmr.msra.gmra.mxu0 %v2575_v41  ;;  %877 = vmatmul.bf16.vlgmr.msra.gmra.mxu2 %v2575_v41  ;;  %v1995_v0 = vor.u32 %v2163_v34, %v1994_v57  ;;  %v1868_v42 = vld [vmem:[#allocation2 + $0xb0] sm:$0xf0]  ;;  %v2121_v58 = vld [vmem:[#allocation2 + $0x54] sm:$0xf0]  ;;  %v2129_v44 = vld [vmem:[#allocation2 + $0x9c] sm:$0xf] }
  0xf9   :  { %953 = vmatpush.bf16.msrb.mxu2 %v1971_v39  ;;  %v259_v56 = vsel %vm254_vm7, %v2463_v3, %v258_v50  ;;  %277 = vst.msk [vmem:[#allocation2 + $0xb8] sm:$0xff] %vm2341_vm2, %v265_v2  ;;  %v2114_v5 = vld [vmem:[#allocation2 + $0x1c] sm:$0xf0]  ;;  %v1923_v3 = vor.u32 %v2145_v48, %v1922_v47  ;;  %v1975_v8 = vor.u32 %v2154_v54, %v1972_v26  ;;  %v1844_v50 = vld [vmem:[#allocation2 + $0x80] sm:$0xf0] }
  0xfa   :  { %274 = vst.msk [vmem:[#allocation2 + $0xa0] sm:$0xff] %vm2341_vm2, %v259_v56  ;;  %v1795_v24 = vor.u32 %v2114_v5, %v1794_v25  ;;  %v1986_v59 = vld [vmem:[#allocation2 + $0x188] sm:$0xf]  ;;  %v2159_v60 = vld [vmem:[#allocation2 + $0x18c] sm:$0xf]  ;;  %v1999_v17 = vor.u32 %v2160_v22, %v1996_v13  ;;  %v1903_v39 = vor.u32 %v2136_v52, %v1900_v32  ;;  %v1871_v46 = vor.u32 %v2129_v44, %v1868_v42 }
  0xfb   :  { %v1987_v61 = vor.u32 %v2162_v55, %v1986_v59  ;;  %v1991_v62 = vor.u32 %v2159_v60, %v1988_v53  ;;  %v1826_v45 = vld [vmem:[#allocation2 + $0x40] sm:$0xf]  ;;  %v2115_v2 = vld [vmem:[#allocation2 + $0x24] sm:$0xf0]  ;;  %v2123_v25 = vld [vmem:[#allocation2 + $0x6c] sm:$0xf] }
  0xfc   :  { %904 = vmatpush.bf16.msrb.mxu1 %v1795_v24  ;;  %v1827_v47 = vor.u32 %v2121_v58, %v1826_v45  ;;  %v1802_v55 = vld [vmem:[#allocation2 + $0x10] sm:$0xf]  ;;  %v1847_v53 = vor.u32 %v2123_v25, %v1844_v50  ;;  %v2124_v26 = vld [vmem:[#allocation2 + $0x74] sm:$0xf]  ;;  %v1828_v57 = vld [vmem:[#allocation2 + $0x58] sm:$0xf0] }
  0xfd   :  { %954 = vmatpush.bf16.msrb.mxu2 %v1947_v51  ;;  %918 = vmatpush.bf16.msrb.mxu3 %v1987_v61  ;;  %v1852_v51 = vld [vmem:[#allocation2 + $0x88] sm:$0xf0]  ;;  %v1803_v54 = vor.u32 %v2115_v2, %v1802_v55  ;;  %v1820_v5 = vld [vmem:[#allocation2 + $0x50] sm:$0xf0]  ;;  %v2117_v24 = vld [vmem:[#allocation2 + $0x3c] sm:$0xf] }
  0xfe   :  { %946 = vmatpush.bf16.msrb.mxu0 %v1991_v62  ;;  %v1855_v56 = vor.u32 %v2124_v26, %v1852_v51  ;;  %v1823_v59 = vor.u32 %v2117_v24, %v1820_v5  ;;  %v2118_v60 = vld [vmem:[#allocation2 + $0x44] sm:$0xf]  ;;  %v1804_v63 = vld [vmem:[#allocation2 + $0x28] sm:$0xf0] }
  0xff   :  { %905 = vmatmul.bf16.vlgmr.msrb.gmra.mxu1 %v2575_v41  ;;  %v1831_v61 = vor.u32 %v2118_v60, %v1828_v57  ;;  %v1796_v62 = vld [vmem:[#allocation2 + $0x20] sm:$0xf0]  ;;  %v2111_v1 = vld [vmem:[#allocation2 + $0xc] sm:$0xf] }
 0x100   :  { %974 = vmatpush.bf16.msra.mxu1 %v1995_v0  ;;  %2002 = vmatmul.msk.bf16.vlgmr.msrb.gmra.mxu3 %vm837_vm9, %v2506_v10  ;;  %v2133_v20 = vld [vmem:[#allocation2 + $0xb4] sm:$0xf0]  ;;  %v1876_v43 = vld [vmem:[#allocation2 + $0xb8] sm:$0xf0]  ;;  %v1799_v4 = vor.u32 %v2111_v1, %v1796_v62  ;;  %v36_v27 = vld [vmem:[%s2970_s9] sm:$0x3f] }
 0x101   :  { %925 = vmatpush.bf16.msra.mxu3 %v1967_v7  ;;  %955 = vmatpush.bf16.msrb.mxu2 %v1923_v3  ;;  %v1874_v49 = vld [vmem:[#allocation2 + $0xa0] sm:$0xf]  ;;  %v2130_v6 = vld [vmem:[#allocation2 + $0xa4] sm:$0xf]  ;;  %v2112_v7 = vld [vmem:[#allocation2 + $0x14] sm:$0xf] }
 0x102   :  { %981 = vmatpush.bf16.msra.mxu0 %v1975_v8  ;;  %v1875_v9 = vor.u32 %v2133_v20, %v1874_v49  ;;  %v1879_v48 = vor.u32 %v2130_v6, %v1876_v43  ;;  %v1807_v3 = vor.u32 %v2112_v7, %v1804_v63  ;;  %v2618_v28 = vperm.slane %v36_v27, 1 }
 0x103   :  { %v2622_v30 = vperm.slane %v36_v27, 0  ;;  %v2640_v58 = vperm.slane %v36_v27, 3  ;;  %v2642_v44 = vperm.slane %v36_v27, 4 }
 0x104   :  { %1002 = vmatpush.bf16.msrb.mxu1 %v1999_v17 }
 0x105   :  { %926 = vmatpush.bf16.msra.mxu3 %v1943_v19  ;;  %956 = vmatpush.bf16.msrb.mxu2 %v1899_v14 }
 0x106   :  { %982 = vmatpush.bf16.msra.mxu0 %v1951_v21 }
 0x108   :  { %2003 = vmatmul.msk.bf16.vlgmr.msrb.gmra.mxu0 %vm837_vm9, %v2506_v10 }
 0x109   :  { %927 = vmatpush.bf16.msra.mxu3 %v1919_v31  ;;  %957 = vmatpush.bf16.msrb.mxu2 %v1875_v9  ;;  %v2626_v31 = vperm.slane %v36_v27, 2 }
 0x10a   :  { %983 = vmatpush.bf16.msra.mxu0 %v1927_v33 }
 0x10d   :  { %928 = vmatpush.bf16.msra.mxu3 %v1895_v37  ;;  %958 = vmatpush.bf16.msrb.mxu2 %v1851_v40 }
 0x10e   :  { %984 = vmatpush.bf16.msra.mxu0 %v1903_v39  ;;  %v2634_v39 = vperm.slane %v36_v27, 5 }
 0x10f   :  { %2004 = vmatmul.msk.bf16.vlgmr.msra.gmra.mxu1 %vm837_vm9, %v2506_v10 }
 0x111   :  { %929 = vmatpush.bf16.msra.mxu3 %v1871_v46  ;;  %959 = vmatpush.bf16.msrb.mxu2 %v1827_v47 }
 0x112   :  { %985 = vmatpush.bf16.msra.mxu0 %v1879_v48 }
 0x115   :  { %930 = vmatpush.bf16.msra.mxu3 %v1847_v53  ;;  %960 = vmatpush.bf16.msrb.mxu2 %v1803_v54 }
 0x116   :  { %986 = vmatpush.bf16.msra.mxu0 %v1855_v56 }
 0x118   :  { %961 = vmatmul.bf16.vlgmr.msrb.gmra.mxu2 %v2575_v41 }
 0x119   :  { %931 = vmatpush.bf16.msra.mxu3 %v1823_v59 }
 0x11a   :  { %987 = vmatpush.bf16.msra.mxu0 %v1831_v61 }
 0x11d   :  { %932 = vmatpush.bf16.msra.mxu3 %v1799_v4 }
 0x11e   :  { %988 = vmatpush.bf16.msra.mxu0 %v1807_v3 }
 0x11f   :  { %2005 = vmatmul.msk.bf16.vlgmr.msrb.gmra.mxu1 %vm837_vm9, %v2506_v10 }
 0x120   :  { %933 = vmatmul.bf16.vlgmr.msra.gmra.mxu3 %v2575_v41 }
 0x121   :  { %989 = vmatmul.bf16.vlgmr.msra.gmra.mxu0 %v2575_v41 }
 0x14a   :  { %v864_v34 = vpop.f32.mrf.mxu1 }
 0x14f   :  { %v892_v22 = vpop.f32.mrf.mxu3 }
 0x152   :  { %v866_v0 = vpop.f32.mrf.mxu1 }
 0x157   :  { %v894_v12 = vpop.f32.mrf.mxu3 }
 0x175   :  { %v850_v8 = vpop.f32.mrf.mxu0 }
 0x176   :  { %v2624_v35 = vadd.f32 %v864_v34, %v850_v8 }
 0x178   :  { %v1011_v40 = vmul.f32 %v2624_v35, %v2622_v30 }
 0x17b   :  { %v878_v13 = vpop.f32.mrf.mxu2 }
 0x17c   :  { %v906_v15 = vpop.f32.mrf.mxu1  ;;  %v2620_v29 = vadd.f32 %v892_v22, %v878_v13 }
 0x17d   :  { %v852_v14 = vpop.f32.mrf.mxu0 }
 0x17e   :  { %v2605_v16 = vadd.f32 %v866_v0, %v852_v14  ;;  %v1012_v32 = vmul.f32 %v2620_v29, %v2618_v28 }
 0x180   :  { %v1017_v43 = vadd.f32 %v1012_v32, %v1011_v40 }
 0x183   :  { %v880_v17 = vpop.f32.mrf.mxu2  ;;  %v920_v18 = vpop.f32.mrf.mxu3 }
 0x184   :  { %v2607_v19 = vadd.f32 %v894_v12, %v880_v17  ;;  %v908_v20 = vpop.f32.mrf.mxu1  ;;  %v2628_v52 = vadd.f32 %v920_v18, %v906_v15 }
 0x185   :  { %v948_v21 = vpop.f32.mrf.mxu0 }
 0x186   :  { %v1013_v42 = vmul.f32 %v2628_v52, %v2626_v31 }
 0x188   :  { %v1018_v48 = vadd.f32 %v1017_v43, %v1013_v42  ;;  %v1009_v42 = vld [vmem:[%s2971_s3] sm:$0xff] }
 0x18b   :  { %v922_v41 = vpop.f32.mrf.mxu3 }
 0x18c   :  { %v2609_v23 = vadd.f32 %v922_v41, %v908_v20  ;;  %v976_v10 = vpop.f32.mrf.mxu1 }
 0x18d   :  { %v2611_v49 = vpop.f32.mrf.mxu0 }
 0x194   :  { %v2613_v9 = vpop.f32.mrf.mxu1 }
 0x19b   :  { %v962_v37 = vpop.f32.mrf.mxu2 }
 0x19c   :  { %v1004_v36 = vpop.f32.mrf.mxu1  ;;  %v2644_v45 = vadd.f32 %v976_v10, %v962_v37 }
 0x19e   :  { %v990_v33 = vpop.f32.mrf.mxu0  ;;  %v1015_v2 = vmul.f32 %v2644_v45, %v2642_v44 }
 0x19f   :  { %v2632_v38 = vadd.f32 %v1004_v36, %v990_v33 }
 0x1a1   :  { %v1016_v47 = vmul.f32 %v2632_v38, %v2634_v39 }
 0x1a3   :  { %v934_v6 = vpop.f32.mrf.mxu3  ;;  %v1022_v25 = vsel %vm1021_vm12, %v1016_v47, 0.0 }
 0x1a4   :  { %v2646_v46 = vadd.f32 %v948_v21, %v934_v6  ;;  %v2214_v21 = vmov 0  }
 0x1a5   :  { %2197 = vset.pattern.permute.xlu1 %v2214_v21  ;;  %1102 = vst [vmem:[#allocation3] sm:$0xf] %v2214_v21  ;;  %2199 = vset.pattern.permute.xlu0 %v2214_v21 }
 0x1a6   :  { %v1014_v50 = vmul.f32 %v2646_v46, %v2640_v58  ;;  %1104 = vst.msk [vmem:[#allocation3 + $0x18] sm:$0xf] %vm1103_vm13, %v2214_v21  ;;  %2198 = vset.pattern.permute.xlu2 %v2214_v21  ;;  %v1676_v21 = vmul.f32 %v2605_v16, %v2622_v30 }
 0x1a8   :  { %v1019_v51 = vadd.f32 %v1018_v48, %v1014_v50  ;;  %v1010_v50 = vld [vmem:[%s2972_s4] sm:$0xff] }
 0x1aa   :  { %v1020_v55 = vadd.f32 %v1019_v51, %v1015_v2 }
 0x1ac   :  { %v1023_v53 = vadd.f32 %v1022_v25, %v1020_v55 }
 0x1ae   :  { %1024 = vadd.xlane.f32.xlu2 %v1023_v53 }
 0x221   :  { %v1025_v54 = vpop.xlane.xlu2 %1024 }
 0x222   :  { %v1026_v26 = vmul.f32 0.001953125, %v1025_v54 }
 0x224   :  { %v1027_v56 = vsub.f32 %v2624_v35, %v1026_v26  ;;  %v1028_v5 = vsub.f32 %v2620_v29, %v1026_v26  ;;  %v1029_v57 = vsub.f32 %v2628_v52, %v1026_v26  ;;  %v1030_v24 = vsub.f32 %v2646_v46, %v1026_v26 }
 0x225   :  { %v1032_v59 = vsub.f32 %v2632_v38, %v1026_v26  ;;  %v1031_v60 = vsub.f32 %v2644_v45, %v1026_v26 }
 0x226   :  { %v1033_v61 = vmul.f32 %v1027_v56, %v1027_v56  ;;  %v1034_v62 = vmul.f32 %v1028_v5, %v1028_v5  ;;  %v1035_v63 = vmul.f32 %v1029_v57, %v1029_v57  ;;  %v1036_v1 = vmul.f32 %v1030_v24, %v1030_v24 }
 0x227   :  { %v1038_v3 = vmul.f32 %v1032_v59, %v1032_v59  ;;  %v1037_v34 = vmul.f32 %v1031_v60, %v1031_v60 }
 0x228   :  { %v1039_v4 = vmul.f32 %v1033_v61, %v2622_v30  ;;  %v1040_v7 = vmul.f32 %v1034_v62, %v2618_v28  ;;  %v1041_v22 = vmul.f32 %v1035_v63, %v2626_v31  ;;  %v1042_v8 = vmul.f32 %v1036_v1, %v2640_v58 }
 0x229   :  { %v1044_v13 = vmul.f32 %v1038_v3, %v2634_v39  ;;  %v1043_v14 = vmul.f32 %v1037_v34, %v2642_v44 }
 0x22a   :  { %v1045_v0 = vadd.f32 %v1040_v7, %v1039_v4 }
 0x22b   :  { %v1049_v18 = vsel %vm1021_vm12, %v1044_v13, 0.0 }
 0x22c   :  { %v1046_v12 = vadd.f32 %v1045_v0, %v1041_v22 }
 0x22e   :  { %v1047_v15 = vadd.f32 %v1046_v12, %v1042_v8 }
 0x230   :  { %v1048_v17 = vadd.f32 %v1047_v15, %v1043_v14 }
 0x232   :  { %v1050_v20 = vadd.f32 %v1049_v18, %v1048_v17  ;;  %v936_v17 = vpop.f32.mrf.mxu3  ;;  %v1677_v18 = vmul.f32 %v2607_v19, %v2618_v28 }
 0x234   :  { %1051 = vadd.xlane.f32.xlu0 %v1050_v20  ;;  %v2716_v20 = vadd.f32 %v2611_v49, %v936_v17  ;;  %v992_v49 = vpop.f32.mrf.mxu0 }
 0x2a7   :  { %v1052_v41 = vpop.xlane.xlu0 %1051 }
 0x2a8   :  { %v1053_v10 = vmul.f32 0.001953125, %v1052_v41  ;;  %v1678_v41 = vmul.f32 %v2609_v23, %v2626_v31 }
 0x2aa   :  { %v1054_v27 = vadd.f32 1e-05, %v1053_v10  ;;  %v964_v10 = vpop.f32.mrf.mxu2 }
 0x2ac   :  { %2200 = vrsqrt.f32 %v1054_v27  ;;  %vm1061_vm15 = vweird.f32 %v1054_v27 }
 0x2b2   :  { %v2201_v32 = vpop.eup %2200 }
 0x2b3   :  { %v1056_v33 = vmul.f32 %v2201_v32, %v1054_v27  ;;  %vm1062_vm14 = vweird.f32 %v2201_v32  ;;  %v1682_v27 = vadd.f32 %v1677_v18, %v1676_v21 }
 0x2b4   :  { %vm1063_vm1 = vmor %vm1061_vm15, %vm1062_vm14 }
 0x2b5   :  { %v1057_v36 = vmul.f32 %v2201_v32, %v1056_v33  ;;  %v1679_v33 = vmul.f32 %v2716_v20, %v2640_v58 }
 0x2b7   :  { %v1058_v37 = vmul.f32 0.5, %v1057_v36  ;;  %v1683_v36 = vadd.f32 %v1682_v27, %v1678_v41 }
 0x2b9   :  { %v1059_v40 = vsub.f32 1.5, %v1058_v37  ;;  %v2726_v37 = vadd.f32 %v2613_v9, %v964_v10 }
 0x2bb   :  { %v1060_v6 = vmul.f32 %v2201_v32, %v1059_v40 }
 0x2bd   :  { %v1064_v43 = vsel %vm1063_vm1, %v2201_v32, %v1060_v6  ;;  %v1006_v32 = vpop.f32.mrf.mxu1 }
 0x2be   :  { %v1065_v47 = vmul.f32 %v1064_v43, %v1009_v42  ;;  %v2728_v40 = vadd.f32 %v1006_v32, %v992_v49  ;;  %v1684_v42 = vadd.f32 %v1683_v36, %v1679_v33  ;;  %v1680_v43 = vmul.f32 %v2726_v37, %v2642_v44 }
 0x2c0   :  { %1068 = vperm.xlu1 %2197, %v1065_v47   ;;  %v1077_v48 = vmul.f32 %v1065_v47, %v1026_v26  ;;  %v1681_v47 = vmul.f32 %v2728_v40, %v2634_v39 }
 0x2c2   :  { %v1078_v2 = vsub.f32 %v1010_v50, %v1077_v48  ;;  %v1685_v48 = vadd.f32 %v1684_v42, %v1680_v43  ;;  %v1686_v50 = vsel %vm1021_vm12, %v1681_v47, 0.0 }
 0x2c8   :  { %1081 = vperm.xlu1 %2197, %v1078_v2   ;;  %v1687_v2 = vadd.f32 %v1686_v50, %v1685_v48 }
 0x332   :  { %v1069_v51 = vpop.permute.xlu1 %1068 }
 0x333   :  { %v1071_v25 = vmul.f32 %v1069_v51, %v2624_v35  ;;  %v1072_v55 = vmul.f32 %v1069_v51, %v2620_v29  ;;  %v1073_v53 = vmul.f32 %v1069_v51, %v2628_v52  ;;  %v1074_v54 = vmul.f32 %v1069_v51, %v2646_v46 }
 0x334   :  { %v1075_v56 = vmul.f32 %v1069_v51, %v2644_v45  ;;  %v1076_v5 = vmul.f32 %v1069_v51, %v2632_v38 }
 0x33a   :  { %v1082_v26 = vpop.permute.xlu1 %1081 }
 0x33b   :  { %v1084_v57 = vadd.f32 %v1082_v26, %v1071_v25  ;;  %v1085_v24 = vadd.f32 %v1082_v26, %v1072_v55  ;;  %v1086_v59 = vadd.f32 %v1082_v26, %v1073_v53  ;;  %v1087_v60 = vadd.f32 %v1082_v26, %v1074_v54 }
 0x33c   :  { %v1088_v61 = vadd.f32 %v1082_v26, %v1075_v56  ;;  %v1089_v62 = vadd.f32 %v1082_v26, %v1076_v5 }
 0x33d   :  { %v1090_v63 = vmax.f32 %v1084_v57, 0.0  ;;  %v1091_v1 = vmax.f32 %v1085_v24, 0.0  ;;  %v1092_v35 = vmax.f32 %v1086_v59, 0.0  ;;  %v1093_v4 = vmax.f32 %v1087_v60, 0.0 }
 0x33e   :  { %v1094_v29 = vmax.f32 %v1088_v61, 0.0  ;;  %v1095_v7 = vmax.f32 %v1089_v62, 0.0 }
 0x33f   :  { %v1096_v52 = vmul.f32 %v1090_v63, %v2622_v30  ;;  %v1097_v46 = vmul.f32 %v1091_v1, %v2618_v28  ;;  %v1098_v45 = vmul.f32 %v1092_v35, %v2626_v31  ;;  %v1099_v38 = vmul.f32 %v1093_v4, %v2640_v58 }
 0x340   :  { %v1100_v3 = vmul.f32 %v1094_v29, %v2642_v44  ;;  %v1101_v34 = vmul.f32 %v1095_v7, %v2634_v39 }
 0x341   :  { %v1105_v22 = vpack.c.bf16 %v1097_v46, %v1096_v52  ;;  %v1106_v0 = vpack.c.bf16 %v1099_v38, %v1098_v45 }
 0x342   :  { %v1107_v8 = vpack.c.bf16 %v1101_v34, %v1100_v3 }
 0x343   :  { %1108 = vst [vmem:[#allocation3 + $0x4] sm:$0xff] %v1105_v22  ;;  %1287 = vrot.lane.b32.xlu0 %v1106_v0, %s2206_s19  ;;  %1261 = vrot.lane.b32.xlu2 %v1106_v0, %s2207_s26 }
 0x344   :  { %1109 = vst [vmem:[#allocation3 + $0xc] sm:$0xff] %v1106_v0  ;;  %1311 = vrot.lane.b32.xlu1 %v1105_v22, %s2209_s28 }
 0x345   :  { %1110 = vst.msk [vmem:[#allocation3 + $0x14] sm:$0xff] %vm2341_vm2, %v1107_v8 }
 0x346   :  { %1224 = vst [vmem:[#allocation4 + $0x60] sm:$0xff] %v1105_v22 }
 0x347   :  { %1225 = vst [vmem:[#allocation4 + $0x68] sm:$0xff] %v1106_v0 }
 0x34a   :  { %v1163_v12 = vld [vmem:[#allocation3] sm:$0xff] }
 0x34b   :  { %v1164_v13 = vld [vmem:[#allocation3 + $0x8] sm:$0xff]  ;;  %1169 = vrot.lane.b32.xlu2 %v1163_v12, %s2211_s23 }
 0x34c   :  { %1313 = vrot.lane.b32.xlu1 %v1106_v0, %s2209_s28  ;;  %1171 = vrot.lane.b32.xlu0 %v1164_v13, %s2211_s23  ;;  %v1307_v14 = vld [vmem:[#allocation3 + $0x14] sm:$0xff] }
 0x34d   :  { %1226 = vst.msk [vmem:[#allocation4 + $0x70] sm:$0xff] %vm2341_vm2, %v1307_v14  ;;  %v1191_v15 = vld [vmem:[#allocation3 + $0x10] sm:$0xff]  ;;  %v1192_v6 = vld [vmem:[#allocation3 + $0x18] sm:$0xf] }
 0x353   :  { %1199 = vrot.lane.b32.xlu2 %v1164_v13, %s2210_s13 }
 0x354   :  { %1259 = vrot.lane.b32.xlu1 %v1105_v22, %s2207_s26  ;;  %1315 = vrot.lane.b32.xlu0 %v1307_v14, %s2209_s28 }
 0x35b   :  { %1119 = vrot.lane.b32.xlu2 %v1164_v13, %s2213_s25 }
 0x35c   :  { %1285 = vrot.lane.b32.xlu1 %v1105_v22, %s2206_s19  ;;  %1143 = vrot.lane.b32.xlu0 %v1163_v12, %s2212_s24 }
 0x363   :  { %1263 = vrot.lane.b32.xlu2 %v1307_v14, %s2207_s26 }
 0x364   :  { %1233 = vrot.lane.b32.xlu1 %v1105_v22, %s2208_s27  ;;  %1289 = vrot.lane.b32.xlu0 %v1307_v14, %s2206_s19 }
 0x36b   :  { %1173 = vrot.lane.b32.xlu2 %v1191_v15, %s2211_s23 }
 0x36c   :  { %1235 = vrot.lane.b32.xlu1 %v1106_v0, %s2208_s27  ;;  %1201 = vrot.lane.b32.xlu0 %v1191_v15, %s2210_s13 }
 0x373   :  { %1121 = vrot.lane.b32.xlu2 %v1191_v15, %s2213_s25 }
 0x374   :  { %1197 = vrot.lane.b32.xlu1 %v1163_v12, %s2210_s13  ;;  %1147 = vrot.lane.b32.xlu0 %v1191_v15, %s2212_s24 }
 0x37c   :  { %1117 = vrot.lane.b32.xlu1 %v1163_v12, %s2213_s25 }
 0x384   :  { %1145 = vrot.lane.b32.xlu1 %v1164_v13, %s2212_s24 }
 0x38c   :  { %1237 = vrot.lane.b32.xlu1 %v1307_v14, %s2208_s27 }
 0x394   :  { %1203 = vrot.lane.b32.xlu1 %v1192_v6, %s2210_s13 }
 0x39c   :  { %1688 = vadd.xlane.f32.xlu2 %v1687_v2 }
 0x39d   :  { %v1262_v9 = vpop.permute.xlu2 %1261 }
 0x39e   :  { %v1266_v5 = vrot.slane %v1262_v9, 4 }
 0x3a5   :  { %v1170_v51 = vpop.permute.xlu2 %1169 }
 0x3a6   :  { %v1175_v59 = vrot.slane %v1170_v51, 4 }
 0x3ad   :  { %v2736_v25 = vpop.permute.xlu2 %1199 }
 0x3b5   :  { %v2738_v55 = vpop.permute.xlu0 %1287  ;;  %v2740_v53 = vpop.permute.xlu2 %1119 }
 0x3b6   :  { %v1312_v54 = vpop.permute.xlu1 %1311  ;;  %v1124_v6 = vrot.slane %v2740_v53, 4  ;;  %v1292_v50 = vrot.slane %v2738_v55, 4 }
 0x3b7   :  { %v1317_v60 = vrot.slane %v1312_v54, 4 }
 0x3bd   :  { %v1264_v56 = vpop.permute.xlu2 %1263 }
 0x3be   :  { %v1314_v26 = vpop.permute.xlu1 %1313  ;;  %v1172_v57 = vpop.permute.xlu0 %1171  ;;  %v1267_v24 = vrot.slane %v1264_v56, 4 }
 0x3bf   :  { %v1318_v61 = vrot.slane %v1314_v26, 4  ;;  %v1176_v62 = vrot.slane %v1172_v57, 4 }
 0x3c0   :  { %v1270_v63 = vsel %vm80_vm0, %v1266_v5, %v1267_v24  ;;  %v1272_v1 = vsel %vm374_vm4, %v1264_v56, %v1267_v24 }
 0x3c1   :  { %v1320_v35 = vsel %vm80_vm0, %v1317_v60, %v1318_v61  ;;  %v1178_v4 = vsel %vm80_vm0, %v1175_v59, %v1176_v62  ;;  %v1271_v29 = vsel %vm374_vm4, %v1262_v9, %v1270_v63  ;;  %1278 = vst.msk [vmem:[#allocation4 + $0xa0] sm:$0xff] %vm2341_vm2, %v1272_v1 }
 0x3c2   :  { %v1321_v7 = vsel %vm480_vm6, %v1312_v54, %v1320_v35  ;;  %v1179_v52 = vsel %vm191_vm8, %v1170_v51, %v1178_v4  ;;  %1277 = vst [vmem:[#allocation4 + $0x98] sm:$0xff] %v1271_v29 }
 0x3c3   :  { %v1434_v46 = vunpack.c.l.b16 %v1321_v7  ;;  %v1435_v45 = vunpack.c.h.b16 %v1321_v7  ;;  %1186 = vst [vmem:[#allocation4 + $0x30] sm:$0xff] %v1179_v52 }
 0x3c5   :  { %v1174_v38 = vpop.permute.xlu2 %1173  ;;  %v1464_v3 = vpack.c.b16 %v1434_v46, %v1434_v46  ;;  %v1465_v34 = vpack.c.b16 %v1435_v45, %v1435_v45 }
 0x3c6   :  { %v1260_v22 = vpop.permute.xlu1 %1259  ;;  %v1316_v0 = vpop.permute.xlu0 %1315  ;;  %v1177_v8 = vrot.slane %v1174_v38, 4 }
 0x3c7   :  { %v1265_v12 = vrot.slane %v1260_v22, 4  ;;  %v1319_v13 = vrot.slane %v1316_v0, 4  ;;  %v1499_v14 = vsel %vm80_vm0, %v1464_v3, 0  ;;  %v1502_v15 = vsel %vm80_vm0, %v1465_v34, 0 }
 0x3c8   :  { %v1180_v17 = vsel %vm80_vm0, %v1176_v62, %v1177_v8  ;;  %v1182_v18 = vsel %vm191_vm8, %v1174_v38, %v1177_v8  ;;  %1519 = vmatpush.bf16.msrb.mxu3 %v1499_v14  ;;  %1532 = vmatpush.bf16.msra.mxu2 %v1502_v15  ;;  %v2096_v14 = vld [vmem:[#allocation4 + $0xa0] sm:$0xf] }
 0x3c9   :  { %v1268_v21 = vsel %vm80_vm0, %v1265_v12, %v1266_v5  ;;  %v1322_v41 = vsel %vm80_vm0, %v1318_v61, %v1319_v13  ;;  %v1324_v10 = vsel %vm480_vm6, %v1316_v0, %v1319_v13  ;;  %1188 = vst.msk [vmem:[#allocation4 + $0x40] sm:$0xff] %vm2341_vm2, %v1182_v18  ;;  %v1181_v33 = vsel %vm191_vm8, %v1172_v57, %v1180_v17 }
 0x3ca   :  { %v1269_v27 = vsel %vm374_vm4, %v1260_v22, %v1268_v21  ;;  %v2762_v32 = vsel %vm480_vm6, %v1314_v26, %v1322_v41  ;;  %1330 = vst.msk [vmem:[#allocation4 + $0xd0] sm:$0xff] %vm2341_vm2, %v1324_v10  ;;  %v1206_v22 = vrot.slane %v2736_v25, 4  ;;  %v2088_v41 = vld [vmem:[#allocation4 + $0x98] sm:$0xf] }
 0x3cb   :  { %1276 = vst [vmem:[#allocation4 + $0x90] sm:$0xff] %v1269_v27  ;;  %v1436_v36 = vunpack.c.l.b16 %v2762_v32 }
 0x3cc   :  { %1187 = vst [vmem:[#allocation4 + $0x38] sm:$0xff] %v1181_v33 }
 0x3cd   :  { %v1122_v49 = vpop.permute.xlu2 %1121  ;;  %v1466_v42 = vpack.c.b16 %v1436_v36, %v1436_v36 }
 0x3ce   :  { %v1286_v43 = vpop.permute.xlu1 %1285  ;;  %v2769_v47 = vpop.permute.xlu0 %1143  ;;  %v1125_v48 = vrot.slane %v1122_v49, 4 }
 0x3cf   :  { %v1291_v2 = vrot.slane %v1286_v43, 4  ;;  %v1505_v9 = vsel %vm80_vm0, %v1466_v42, 0 }
 0x3d0   :  { %v1128_v51 = vsel %vm80_vm0, %v1124_v6, %v1125_v48  ;;  %v1130_v54 = vsel %vm82_vm11, %v1122_v49, %v1125_v48  ;;  %1545 = vmatpush.bf16.msra.mxu1 %v1505_v9 }
 0x3d1   :  { %v1294_v56 = vsel %vm80_vm0, %v1291_v2, %v1292_v50  ;;  %v1129_v5 = vsel %vm82_vm11, %v2740_v53, %v1128_v51  ;;  %1136 = vst.msk [vmem:[#allocation4 + $0x10] sm:$0xff] %vm2341_vm2, %v1130_v54  ;;  %v2782_v26 = vld [vmem:[#allocation4 + $0xd0] sm:$0xff]  ;;  %v2176_v2 = vld [vmem:[#allocation4 + $0x64] sm:$0xf] }
 0x3d2   :  { %v1295_v57 = vsel %vm427_vm3, %v1286_v43, %v1294_v56  ;;  %1135 = vst [vmem:[#allocation4 + $0x8] sm:$0xff] %v1129_v5  ;;  %v1438_v24 = vunpack.c.l.b16 %v2782_v26  ;;  %v2080_v4 = vld [vmem:[#allocation4 + $0x90] sm:$0xf]  ;;  %v2182_v29 = vld [vmem:[#allocation4 + $0x94] sm:$0xf] }
 0x3d3   :  { %1302 = vst [vmem:[#allocation4 + $0xa8] sm:$0xff] %v1295_v57 }
 0x3d4   :  { %v1468_v59 = vpack.c.b16 %v1438_v24, %v1438_v24 }
 0x3d6   :  { %v1234_v60 = vpop.permute.xlu1 %1233  ;;  %v1290_v61 = vpop.permute.xlu0 %1289  ;;  %v1511_v62 = vsel %vm80_vm0, %v1468_v59, 0  ;;  %v2032_v59 = vld [vmem:[#allocation4 + $0x30] sm:$0xf] }
 0x3d7   :  { %v1293_v63 = vrot.slane %v1290_v61, 4  ;;  %1571 = vmatpush.bf16.msrb.mxu0 %v1511_v62  ;;  %v1239_v0 = vrot.slane %v1234_v60, 4  ;;  %v2170_v62 = vld [vmem:[#allocation4 + $0x34] sm:$0xf] }
 0x3d9   :  { %v1296_v1 = vsel %vm80_vm0, %v1292_v50, %v1293_v63  ;;  %v1298_v35 = vsel %vm427_vm3, %v1290_v61, %v1293_v63  ;;  %v2056_v50 = vld [vmem:[#allocation4 + $0x60] sm:$0xf] }
 0x3da   :  { %v1297_v7 = vsel %vm427_vm3, %v2738_v55, %v1296_v1  ;;  %1304 = vst.msk [vmem:[#allocation4 + $0xb8] sm:$0xff] %vm2341_vm2, %v1298_v35  ;;  %v2185_v52 = vld [vmem:[#allocation4 + $0xa4] sm:$0xf0]  ;;  %v2082_v46 = vld [vmem:[#allocation4 + $0xa8] sm:$0xf0]  ;;  %vm1494_vm3 = vcmask 588800  }
 0x3db   :  { %1303 = vst [vmem:[#allocation4 + $0xb0] sm:$0xff] %v1297_v7  ;;  %v2081_v45 = vor.u32 %v2185_v52, %v2080_v4  ;;  %v2085_v38 = vor.u32 %v2182_v29, %v2082_v46  ;;  %v1149_v29 = vrot.slane %v2769_v47, 4 }
 0x3dd   :  { %1520 = vmatpush.bf16.msrb.mxu3 %v2081_v45  ;;  %1533 = vmatpush.bf16.msra.mxu2 %v2085_v38  ;;  %v1437_v45 = vunpack.c.h.b16 %v2762_v32  ;;  %v1439_v38 = vunpack.c.h.b16 %v2782_v26 }
 0x3de   :  { %v2793_v3 = vpop.permute.xlu1 %1235  ;;  %v2795_v34 = vpop.permute.xlu0 %1201 }
 0x3df   :  { %v1240_v8 = vrot.slane %v2793_v3, 4  ;;  %v1207_v55 = vrot.slane %v2795_v34, 4 }
 0x3e1   :  { %v1242_v12 = vsel %vm80_vm0, %v1239_v0, %v1240_v8  ;;  %v1211_v13 = vsel %vm80_vm0, %v1206_v22, %v1207_v55  ;;  %v2187_v15 = vld [vmem:[#allocation4 + $0xb4] sm:$0xf0] }
 0x3e2   :  { %v1243_v17 = vsel %vm321_vm5, %v1234_v60, %v1242_v12  ;;  %v1212_v18 = vsel %vm254_vm7, %v2736_v25, %v1211_v13  ;;  %v2097_v21 = vor.u32 %v2187_v15, %v2096_v14  ;;  %v2186_v10 = vld [vmem:[#allocation4 + $0xac] sm:$0xf0]  ;;  %v1467_v12 = vpack.c.b16 %v1437_v45, %v1437_v45 }
 0x3e3   :  { %1250 = vst [vmem:[#allocation4 + $0x78] sm:$0xff] %v1243_v17  ;;  %v2089_v27 = vor.u32 %v2186_v10, %v2088_v41 }
 0x3e4   :  { %1219 = vst [vmem:[#allocation4 + $0x50] sm:$0xff] %v1212_v18  ;;  %1572 = vmatpush.bf16.msrb.mxu0 %v2097_v21  ;;  %v1469_v18 = vpack.c.b16 %v1439_v38, %v1439_v38  ;;  %v1508_v10 = vsel %vm80_vm0, %v1467_v12, 0  ;;  %v2165_v12 = vld [vmem:[#allocation4 + $0xc] sm:$0xf] }
 0x3e5   :  { %1546 = vmatpush.bf16.msra.mxu1 %v2089_v27  ;;  %v2098_v27 = vld [vmem:[#allocation4 + $0xb8] sm:$0xf0] }
 0x3e6   :  { %v1198_v33 = vpop.permute.xlu1 %1197  ;;  %v1148_v36 = vpop.permute.xlu0 %1147 }
 0x3e7   :  { %v1205_v49 = vrot.slane %v1198_v33, 4  ;;  %v1151_v42 = vrot.slane %v1148_v36, 4 }
 0x3e9   :  { %v1209_v43 = vsel %vm80_vm0, %v1205_v49, %v1206_v22  ;;  %v1156_v48 = vsel %vm138_vm10, %v1148_v36, %v1151_v42 }
 0x3ea   :  { %v1210_v25 = vsel %vm254_vm7, %v1198_v33, %v1209_v43  ;;  %1162 = vst.msk [vmem:[#allocation4 + $0x28] sm:$0xff] %vm2341_vm2, %v1156_v48  ;;  %v2179_v9 = vld [vmem:[#allocation4 + $0x74] sm:$0xf0]  ;;  %v2058_v51 = vld [vmem:[#allocation4 + $0x78] sm:$0xf0] }
 0x3eb   :  { %1218 = vst [vmem:[#allocation4 + $0x48] sm:$0xff] %v1210_v25  ;;  %v2057_v54 = vor.u32 %v2179_v9, %v2056_v50  ;;  %v2061_v56 = vor.u32 %v2176_v2, %v2058_v51  ;;  %v2835_v33 = vld [vmem:[%s2973_s2] sm:$0xf]  ;;  %v2184_v43 = vld [vmem:[#allocation4 + $0xa4] sm:$0xf] }
 0x3ec   :  { %v2101_v50 = vor.u32 %v2184_v43, %v2098_v27  ;;  %v2064_v2 = vld [vmem:[#allocation4 + $0x68] sm:$0xf]  ;;  %v2072_v9 = vld [vmem:[#allocation4 + $0x70] sm:$0xf] }
 0x3ed   :  { %1521 = vmatpush.bf16.msrb.mxu3 %v2057_v54  ;;  %1534 = vmatpush.bf16.msra.mxu2 %v2061_v56 }
 0x3ee   :  { %v1118_v5 = vpop.permute.xlu1 %1117 }
 0x3ef   :  { %v1123_v57 = vrot.slane %v1118_v5, 4 }
 0x3f1   :  { %v1126_v24 = vsel %vm80_vm0, %v1123_v57, %v1124_v6 }
 0x3f2   :  { %v1127_v60 = vsel %vm82_vm11, %v1118_v5, %v1126_v24  ;;  %v2173_v61 = vld [vmem:[#allocation4 + $0x44] sm:$0xf0]  ;;  %v2034_v63 = vld [vmem:[#allocation4 + $0x48] sm:$0xf0] }
 0x3f3   :  { %1134 = vst [vmem:[#allocation4] sm:$0xff] %v1127_v60  ;;  %v2033_v1 = vor.u32 %v2173_v61, %v2032_v59  ;;  %v2037_v35 = vor.u32 %v2170_v62, %v2034_v63  ;;  %v2177_v24 = vld [vmem:[#allocation4 + $0x6c] sm:$0xf]  ;;  %v2178_v62 = vld [vmem:[#allocation4 + $0x74] sm:$0xf] }
 0x3f4   :  { %v2174_v63 = vld [vmem:[#allocation4 + $0x4c] sm:$0xf0] }
 0x3f5   :  { %1522 = vmatpush.bf16.msrb.mxu3 %v2033_v1  ;;  %1535 = vmatpush.bf16.msra.mxu2 %v2037_v35  ;;  %v2042_v1 = vld [vmem:[#allocation4 + $0x50] sm:$0xf0] }
 0x3f6   :  { %v1146_v4 = vpop.permute.xlu1 %1145 }
 0x3f7   :  { %v1150_v7 = vrot.slane %v1146_v4, 4 }
 0x3f9   :  { %v1152_v52 = vsel %vm80_vm0, %v1149_v29, %v1150_v7  ;;  %v1154_v53 = vsel %vm80_vm0, %v1150_v7, %v1151_v42  ;;  %v2183_v42 = vld [vmem:[#allocation4 + $0x9c] sm:$0xf] }
 0x3fa   :  { %v1153_v6 = vsel %vm138_vm10, %v2769_v47, %v1152_v52  ;;  %v1155_v46 = vsel %vm138_vm10, %v1146_v4, %v1154_v53  ;;  %v2008_v15 = vld [vmem:[#allocation4] sm:$0xf]  ;;  %v2164_v17 = vld [vmem:[#allocation4 + $0x4] sm:$0xf]  ;;  %v2171_v4 = vld [vmem:[#allocation4 + $0x3c] sm:$0xf] }
 0x3fb   :  { %1160 = vst [vmem:[#allocation4 + $0x18] sm:$0xff] %v1153_v6  ;;  %v2045_v29 = vor.u32 %v2171_v4, %v2042_v1  ;;  %v2048_v52 = vld [vmem:[#allocation4 + $0x40] sm:$0xf]  ;;  %v2172_v53 = vld [vmem:[#allocation4 + $0x44] sm:$0xf] }
 0x3fc   :  { %1161 = vst [vmem:[#allocation4 + $0x20] sm:$0xff] %v1155_v46  ;;  %v2016_v6 = vld [vmem:[#allocation4 + $0x8] sm:$0xf] }
 0x3fe   :  { %v1238_v22 = vpop.permute.xlu1 %1237 }
 0x3ff   :  { %v1241_v0 = vrot.slane %v1238_v22, 4 }
 0x401   :  { %v1244_v13 = vsel %vm80_vm0, %v1240_v8, %v1241_v0  ;;  %v1246_v14 = vsel %vm321_vm5, %v1238_v22, %v1241_v0  ;;  %v1514_v8 = vsel %vm80_vm0, %v1469_v18, 0 }
 0x402   :  { %v1245_v47 = vsel %vm321_vm5, %v2793_v3, %v1244_v13  ;;  %1252 = vst.msk [vmem:[#allocation4 + $0x88] sm:$0xff] %vm2341_vm2, %v1246_v14  ;;  %v2167_v21 = vld [vmem:[#allocation4 + $0x14] sm:$0xf0]  ;;  %v2010_v32 = vld [vmem:[#allocation4 + $0x18] sm:$0xf0] }
 0x403   :  { %1251 = vst [vmem:[#allocation4 + $0x80] sm:$0xff] %v1245_v47  ;;  %v2009_v26 = vor.u32 %v2167_v21, %v2008_v15  ;;  %v2013_v41 = vor.u32 %v2164_v17, %v2010_v32  ;;  %v2090_v3 = vld [vmem:[#allocation4 + $0xb0] sm:$0xf0]  ;;  %v2168_v7 = vld [vmem:[#allocation4 + $0x1c] sm:$0xf0] }
 0x404   :  { %v2093_v48 = vor.u32 %v2183_v42, %v2090_v3  ;;  %v2018_v11 = vld [vmem:[#allocation4 + $0x20] sm:$0xf0]  ;;  %v2017_v38 = vor.u32 %v2168_v7, %v2016_v6  ;;  %v2169_v14 = vld [vmem:[#allocation4 + $0x24] sm:$0xf0]  ;;  %v2026_v15 = vld [vmem:[#allocation4 + $0x28] sm:$0xf0] }
 0x405   :  { %1523 = vmatpush.bf16.msrb.mxu3 %v2009_v26  ;;  %1536 = vmatpush.bf16.msra.mxu2 %v2013_v41  ;;  %v2021_v13 = vor.u32 %v2165_v12, %v2018_v11  ;;  %v2024_v17 = vld [vmem:[#allocation4 + $0x10] sm:$0xf]  ;;  %v2166_v47 = vld [vmem:[#allocation4 + $0x14] sm:$0xf] }
 0x406   :  { %v1204_v36 = vpop.permute.xlu1 %1203  ;;  %v2025_v18 = vor.u32 %v2169_v14, %v2024_v17  ;;  %v2029_v21 = vor.u32 %v2166_v47, %v2026_v15 }
 0x407   :  { %v1208_v49 = vrot.slane %v1204_v36, 4 }
 0x408   :  { %2102 = vmatmul.msk.bf16.vlgmr.msrb.gmra.mxu3 %vm1494_vm3, %v2835_v33  ;;  %2103 = vmatmul.msk.bf16.vlgmr.msra.gmra.mxu2 %vm1494_vm3, %v2835_v33 }
 0x409   :  { %1558 = vmatpush.bf16.msra.mxu3 %v1508_v10  ;;  %1584 = vmatpush.bf16.msrb.mxu2 %v1514_v8  ;;  %v1213_v25 = vsel %vm80_vm0, %v1207_v55, %v1208_v49  ;;  %v2181_v51 = vld [vmem:[#allocation4 + $0x84] sm:$0xf0]  ;;  %v2074_v54 = vld [vmem:[#allocation4 + $0x88] sm:$0xf0] }
 0x40a   :  { %v1214_v56 = vsel %vm254_vm7, %v2795_v34, %v1213_v25  ;;  %v2073_v5 = vor.u32 %v2181_v51, %v2072_v9  ;;  %v2180_v57 = vld [vmem:[#allocation4 + $0x7c] sm:$0xf0]  ;;  %v2066_v59 = vld [vmem:[#allocation4 + $0x80] sm:$0xf0]  ;;  %v2077_v55 = vor.u32 %v2178_v62, %v2074_v54  ;;  %v2040_v34 = vld [vmem:[#allocation4 + $0x38] sm:$0xf] }
 0x40b   :  { %1220 = vst.msk [vmem:[#allocation4 + $0x58] sm:$0xff] %vm2341_vm2, %v1214_v56  ;;  %v2065_v60 = vor.u32 %v2180_v57, %v2064_v2  ;;  %v2069_v61 = vor.u32 %v2177_v24, %v2066_v59  ;;  %v2041_v35 = vor.u32 %v2174_v63, %v2040_v34 }
 0x40c   :  { %1573 = vmatpush.bf16.msrb.mxu0 %v2073_v5 }
 0x40d   :  { %1559 = vmatpush.bf16.msra.mxu3 %v2093_v48  ;;  %1585 = vmatpush.bf16.msrb.mxu2 %v2101_v50 }
 0x40e   :  { %1547 = vmatpush.bf16.msra.mxu1 %v2065_v60 }
 0x40f   :  { %v1689_v32 = vpop.xlane.xlu2 %1688 }
 0x410   :  { %v2860_v10 = vmul.f32 0.001953125, %v1689_v32 }
 0x411   :  { %1560 = vmatpush.bf16.msra.mxu3 %v2069_v61  ;;  %1586 = vmatpush.bf16.msrb.mxu2 %v2077_v55 }
 0x412   :  { %1548 = vmatpush.bf16.msra.mxu1 %v2041_v35  ;;  %v2175_v46 = vld [vmem:[#allocation4 + $0x54] sm:$0xf0]  ;;  %v2050_v45 = vld [vmem:[#allocation4 + $0x58] sm:$0xf0]  ;;  %v1691_v27 = vsub.f32 %v2605_v16, %v2860_v10  ;;  %v1692_v8 = vsub.f32 %v2607_v19, %v2860_v10  ;;  %v1694_v54 = vsub.f32 %v2716_v20, %v2860_v10  ;;  %v1695_v55 = vsub.f32 %v2726_v37, %v2860_v10 }
 0x413   :  { %v2049_v22 = vor.u32 %v2175_v46, %v2048_v52  ;;  %v2053_v0 = vor.u32 %v2172_v53, %v2050_v45  ;;  %v1696_v35 = vsub.f32 %v2728_v40, %v2860_v10 }
 0x414   :  { %v1697_v49 = vmul.f32 %v1691_v27, %v1691_v27  ;;  %v1698_v42 = vmul.f32 %v1692_v8, %v1692_v8  ;;  %v1700_v63 = vmul.f32 %v1694_v54, %v1694_v54  ;;  %v1701_v11 = vmul.f32 %v1695_v55, %v1695_v55 }
 0x415   :  { %1561 = vmatpush.bf16.msra.mxu3 %v2045_v29  ;;  %1574 = vmatpush.bf16.msrb.mxu0 %v2049_v22  ;;  %v1702_v45 = vmul.f32 %v1696_v35, %v1696_v35 }
 0x416   :  { %1549 = vmatpush.bf16.msra.mxu1 %v2017_v38  ;;  %1587 = vmatpush.bf16.msrb.mxu2 %v2053_v0  ;;  %v1703_v2 = vmul.f32 %v1697_v49, %v2622_v30  ;;  %v1704_v25 = vmul.f32 %v1698_v42, %v2618_v28  ;;  %v1706_v6 = vmul.f32 %v1700_v63, %v2640_v58 }
 0x417   :  { %v1707_v12 = vmul.f32 %v1701_v11, %v2642_v44 }
 0x418   :  { %v1709_v24 = vadd.f32 %v1704_v25, %v1703_v2 }
 0x419   :  { %1562 = vmatpush.bf16.msra.mxu3 %v2021_v13  ;;  %2104 = vmatmul.msk.bf16.vlgmr.msra.gmra.mxu1 %vm1494_vm3, %v2835_v33  ;;  %v1708_v13 = vmul.f32 %v1702_v45, %v2634_v39 }
 0x41a   :  { %1575 = vmatpush.bf16.msrb.mxu0 %v2025_v18  ;;  %1588 = vmatpush.bf16.msrb.mxu2 %v2029_v21 }
 0x41b   :  { %v1713_v17 = vsel %vm1021_vm12, %v1708_v13, 0.0  ;;  %v1594_v13 = vld [vmem:[%s2975_s5] sm:$0xff] }
 0x41c   :  { %2105 = vmatmul.msk.bf16.vlgmr.msra.gmra.mxu3 %vm1494_vm3, %v2835_v33 }
 0x41d   :  { %2106 = vmatmul.msk.bf16.vlgmr.msrb.gmra.mxu0 %vm1494_vm3, %v2835_v33  ;;  %2107 = vmatmul.msk.bf16.vlgmr.msrb.gmra.mxu2 %vm1494_vm3, %v2835_v33  ;;  %v1693_v33 = vsub.f32 %v2609_v23, %v2860_v10 }
 0x41f   :  { %v1699_v56 = vmul.f32 %v1693_v33, %v1693_v33 }
 0x421   :  { %v1705_v1 = vmul.f32 %v1699_v56, %v2626_v31 }
 0x423   :  { %v1710_v29 = vadd.f32 %v1709_v24, %v1705_v1 }
 0x425   :  { %v1711_v0 = vadd.f32 %v1710_v29, %v1706_v6 }
 0x427   :  { %v1712_v15 = vadd.f32 %v1711_v0, %v1707_v12 }
 0x429   :  { %v1714_v18 = vadd.f32 %v1713_v17, %v1712_v15 }
 0x48b   :  { %v2856_v26 = vpop.f32.mrf.mxu3  ;;  %v2858_v41 = vpop.f32.mrf.mxu2 }
 0x48c   :  { %v1596_v48 = vmul.f32 %v2856_v26, %v2622_v30  ;;  %v1597_v50 = vmul.f32 %v2858_v41, %v2618_v28 }
 0x48e   :  { %v1602_v5 = vadd.f32 %v1597_v50, %v1596_v48 }
 0x493   :  { %v1527_v3 = vpop.f32.mrf.mxu3  ;;  %v1540_v36 = vpop.f32.mrf.mxu2 }
 0x496   :  { %v2866_v43 = vpop.f32.mrf.mxu1 }
 0x497   :  { %v1598_v9 = vmul.f32 %v2866_v43, %v2626_v31 }
 0x499   :  { %v1603_v59 = vadd.f32 %v1602_v5, %v1598_v9 }
 0x49a   :  { %v2878_v51 = vpop.f32.mrf.mxu0 }
 0x49b   :  { %v1600_v60 = vmul.f32 %v2878_v51, %v2642_v44 }
 0x49e   :  { %v1553_v62 = vpop.f32.mrf.mxu1 }
 0x49f   :  { %v2882_v57 = vpop.f32.mrf.mxu3 }
 0x4a0   :  { %v1599_v61 = vmul.f32 %v2882_v57, %v2640_v58  ;;  %v2893_v4 = vpop.f32.mrf.mxu2 }
 0x4a1   :  { %v1601_v7 = vmul.f32 %v2893_v4, %v2634_v39 }
 0x4a2   :  { %v1604_v34 = vadd.f32 %v1603_v59, %v1599_v61  ;;  %v1579_v52 = vpop.f32.mrf.mxu0 }
 0x4a3   :  { %v1606_v46 = vsel %vm1021_vm12, %v1601_v7, 0.0 }
 0x4a4   :  { %v1605_v53 = vadd.f32 %v1604_v34, %v1600_v60 }
 0x4a6   :  { %v1607_v22 = vadd.f32 %v1606_v46, %v1605_v53 }
 0x4a7   :  { %v1566_v38 = vpop.f32.mrf.mxu3 }
 0x4a8   :  { %1608 = vadd.xlane.f32.xlu1 %v1607_v22  ;;  %v1592_v14 = vpop.f32.mrf.mxu2 }
 0x4b0   :  { %1715 = vadd.xlane.f32.xlu1 %v1714_v18  ;;  %v1595_v18 = vld [vmem:[%s2976_s6] sm:$0xff] }
 0x51b   :  { %v1609_v47 = vpop.xlane.xlu1 %1608 }
 0x51c   :  { %v2902_v21 = vmul.f32 0.001953125, %v1609_v47 }
 0x51e   :  { %v1611_v32 = vsub.f32 %v2856_v26, %v2902_v21  ;;  %v1612_v27 = vsub.f32 %v2858_v41, %v2902_v21  ;;  %v1613_v8 = vsub.f32 %v2866_v43, %v2902_v21  ;;  %v1614_v3 = vsub.f32 %v2882_v57, %v2902_v21 }
 0x51f   :  { %v1616_v36 = vsub.f32 %v2893_v4, %v2902_v21  ;;  %v1615_v49 = vsub.f32 %v2878_v51, %v2902_v21 }
 0x520   :  { %v1617_v42 = vmul.f32 %v1611_v32, %v1611_v32  ;;  %v1618_v33 = vmul.f32 %v1612_v27, %v1612_v27  ;;  %v1619_v48 = vmul.f32 %v1613_v8, %v1613_v8  ;;  %v1620_v50 = vmul.f32 %v1614_v3, %v1614_v3  ;;  %v1675_v8 = vld [vmem:[%s2977_s8] sm:$0xff] }
 0x521   :  { %v1622_v54 = vmul.f32 %v1616_v36, %v1616_v36  ;;  %v1621_v5 = vmul.f32 %v1615_v49, %v1615_v49 }
 0x522   :  { %v1623_v2 = vmul.f32 %v1617_v42, %v2622_v30  ;;  %v1624_v25 = vmul.f32 %v1618_v33, %v2618_v28  ;;  %v1625_v24 = vmul.f32 %v1619_v48, %v2626_v31  ;;  %v1626_v61 = vmul.f32 %v1620_v50, %v2640_v58 }
 0x523   :  { %v1716_v9 = vpop.xlane.xlu1 %1715  ;;  %v1628_v55 = vmul.f32 %v1622_v54, %v2634_v39  ;;  %v1627_v63 = vmul.f32 %v1621_v5, %v2642_v44  ;;  %v1674_v39 = vld [vmem:[%s2974_s7] sm:$0xff] }
 0x524   :  { %v1717_v56 = vmul.f32 0.001953125, %v1716_v9  ;;  %v1629_v59 = vadd.f32 %v1624_v25, %v1623_v2 }
 0x525   :  { %v1633_v28 = vsel %vm1021_vm12, %v1628_v55, 0.0 }
 0x526   :  { %v1718_v60 = vadd.f32 1e-05, %v1717_v56  ;;  %v1630_v62 = vadd.f32 %v1629_v59, %v1625_v24 }
 0x528   :  { %2202 = vrsqrt.f32 %v1718_v60  ;;  %v1631_v1 = vadd.f32 %v1630_v62, %v1626_v61  ;;  %vm1725_vm2 = vweird.f32 %v1718_v60 }
 0x52a   :  { %v1632_v30 = vadd.f32 %v1631_v1, %v1627_v63 }
 0x52c   :  { %v1634_v34 = vadd.f32 %v1633_v28, %v1632_v30 }
 0x52e   :  { %v2203_v35 = vpop.eup %2202  ;;  %1635 = vadd.xlane.f32.xlu0 %v1634_v34 }
 0x52f   :  { %v1720_v29 = vmul.f32 %v2203_v35, %v1718_v60  ;;  %vm1726_vm0 = vweird.f32 %v2203_v35 }
 0x530   :  { %vm1727_vm4 = vmor %vm1725_vm2, %vm1726_vm0 }
 0x531   :  { %v1721_v7 = vmul.f32 %v2203_v35, %v1720_v29 }
 0x533   :  { %v1722_v31 = vmul.f32 0.5, %v1721_v7 }
 0x535   :  { %v1723_v52 = vsub.f32 1.5, %v1722_v31 }
 0x537   :  { %v1724_v53 = vmul.f32 %v2203_v35, %v1723_v52 }
 0x539   :  { %v1728_v58 = vsel %vm1727_vm4, %v2203_v35, %v1724_v53 }
 0x53a   :  { %v1729_v44 = vmul.f32 %v1728_v58, %v1674_v39 }
 0x53c   :  { %v1741_v27 = vmul.f32 %v1729_v44, %v2860_v10 }
 0x53e   :  { %v1742_v3 = vsub.f32 %v1675_v8, %v1741_v27 }
 0x542   :  { %1732 = vperm.xlu0 %2199, %v1729_v44  }
 0x5a1   :  { %v1636_v11 = vpop.xlane.xlu0 %1635 }
 0x5a2   :  { %v1637_v6 = vmul.f32 0.001953125, %v1636_v11 }
 0x5a4   :  { %v1638_v46 = vadd.f32 1e-05, %v1637_v6 }
 0x5a6   :  { %2204 = vrsqrt.f32 %v1638_v46  ;;  %vm1645_vm6 = vweird.f32 %v1638_v46 }
 0x5ac   :  { %v2205_v45 = vpop.eup %2204 }
 0x5ad   :  { %v1640_v38 = vmul.f32 %v2205_v45, %v1638_v46  ;;  %vm1646_vm5 = vweird.f32 %v2205_v45 }
 0x5ae   :  { %vm1647_vm7 = vmor %vm1645_vm6, %vm1646_vm5 }
 0x5af   :  { %v1641_v22 = vmul.f32 %v2205_v45, %v1640_v38 }
 0x5b1   :  { %v1642_v0 = vmul.f32 0.5, %v1641_v22 }
 0x5b3   :  { %v1643_v12 = vsub.f32 1.5, %v1642_v0 }
 0x5b4   :  { %v1733_v49 = vpop.permute.xlu0 %1732 }
 0x5b5   :  { %v1644_v14 = vmul.f32 %v2205_v45, %v1643_v12  ;;  %v1735_v42 = vmul.f32 %v1733_v49, %v2605_v16  ;;  %v1736_v33 = vmul.f32 %v1733_v49, %v2607_v19  ;;  %v1737_v48 = vmul.f32 %v1733_v49, %v2609_v23 }
 0x5b6   :  { %v1739_v10 = vmul.f32 %v1733_v49, %v2726_v37  ;;  %v1740_v2 = vmul.f32 %v1733_v49, %v2728_v40 }
 0x5b7   :  { %v1648_v15 = vsel %vm1647_vm7, %v2205_v45, %v1644_v14 }
 0x5b8   :  { %v1649_v17 = vmul.f32 %v1648_v15, %v1594_v13 }
 0x5ba   :  { %1652 = vperm.xlu2 %2198, %v1649_v17   ;;  %v1661_v47 = vmul.f32 %v1649_v17, %v2902_v21  ;;  %v1738_v21 = vmul.f32 %v1733_v49, %v2716_v20 }
 0x5bc   :  { %v1662_v32 = vsub.f32 %v1595_v18, %v1661_v47 }
 0x5be   :  { %1665 = vperm.xlu1 %2197, %v1662_v32  }
 0x5c2   :  { %1745 = vperm.xlu2 %2198, %v1742_v3  }
 0x614   :  { %v1653_v36 = vpop.permute.xlu2 %1652 }
 0x615   :  { %v1655_v25 = vmul.f32 %v1653_v36, %v2856_v26  ;;  %v1656_v9 = vmul.f32 %v1653_v36, %v2858_v41  ;;  %v1657_v54 = vmul.f32 %v1653_v36, %v2866_v43  ;;  %v1658_v56 = vmul.f32 %v1653_v36, %v2882_v57 }
 0x616   :  { %v1659_v16 = vmul.f32 %v1653_v36, %v2878_v51  ;;  %v1660_v19 = vmul.f32 %v1653_v36, %v2893_v4 }
 0x61c   :  { %v1746_v50 = vpop.permute.xlu2 %1745 }
 0x61d   :  { %v1748_v23 = vadd.f32 %v1746_v50, %v1735_v42  ;;  %v1749_v5 = vadd.f32 %v1746_v50, %v1736_v33  ;;  %v1750_v20 = vadd.f32 %v1746_v50, %v1737_v48  ;;  %v1751_v24 = vadd.f32 %v1746_v50, %v1738_v21 }
 0x61e   :  { %v1752_v26 = vadd.f32 %v1746_v50, %v1739_v10  ;;  %v1753_v62 = vadd.f32 %v1746_v50, %v1740_v2 }
 0x630   :  { %v1666_v59 = vpop.permute.xlu1 %1665 }
 0x631   :  { %v1668_v37 = vadd.f32 %v1666_v59, %v1655_v25  ;;  %v1669_v60 = vadd.f32 %v1666_v59, %v1656_v9  ;;  %v1670_v40 = vadd.f32 %v1666_v59, %v1657_v54  ;;  %v1671_v61 = vadd.f32 %v1666_v59, %v1658_v56 }
 0x632   :  { %v1672_v41 = vadd.f32 %v1666_v59, %v1659_v16  ;;  %v1673_v55 = vadd.f32 %v1666_v59, %v1660_v19 }
 0x633   :  { %v1754_v43 = vadd.f32 %v1748_v23, %v1668_v37  ;;  %v1755_v63 = vadd.f32 %v1749_v5, %v1669_v60  ;;  %v1756_v57 = vadd.f32 %v1750_v20, %v1670_v40  ;;  %v1757_v1 = vadd.f32 %v1751_v24, %v1671_v61 }
 0x634   :  { %v1758_v51 = vadd.f32 %v1752_v26, %v1672_v41  ;;  %v1759_v30 = vadd.f32 %v1753_v62, %v1673_v55 }
 0x635   :  { %v1760_v4 = vmax.f32 %v1754_v43, 0.0  ;;  %v1761_v28 = vmax.f32 %v1755_v63, 0.0  ;;  %v1762_v34 = vmax.f32 %v1756_v57, 0.0  ;;  %v1763_v35 = vmax.f32 %v1757_v1, 0.0 }
 0x636   :  { %v1764_v29 = vmax.f32 %v1758_v51, 0.0  ;;  %v1765_v7 = vmax.f32 %v1759_v30, 0.0 }
 0x637   :  { %1766 = vst [vmem:[%s2978_s10] sm:$0xff] %v1760_v4 }
 0x638   :  { %1767 = vst [vmem:[%s2978_s10 + $0x8] sm:$0xff] %v1761_v28 }
 0x639   :  { %1768 = vst [vmem:[%s2978_s10 + $0x10] sm:$0xff] %v1762_v34 }
 0x63a   :  { %1769 = vst [vmem:[%s2978_s10 + $0x18] sm:$0xff] %v1763_v35 }
 0x63b   :  { %1770 = vst [vmem:[%s2978_s10 + $0x20] sm:$0xff] %v1764_v29 }
 0x63c   :  { %1771 = vst.msk [vmem:[%s2978_s10 + $0x28] sm:$0xff] %vm1021_vm12, %v1765_v7 }

</bundles_post_ra>
